<compile_context>
chip_gen: v5e
topology: v5e:2x2
jax: 0.10.0
libtpu: 0.0.40
codegen_flags: <defaults>
</compile_context>

<pallas_src>
import jax
import jax.numpy as jnp
from jax import lax
from jax.experimental import pallas as pl
from jax.experimental.pallas import tpu as pltpu

HIDDEN = 128     # fixed by the module: nn.Embedding(V,128), nn.LSTM(128,128)
LANES = 128
SUBLANES = 8


def _round_up(x, m):
    return (x + m - 1) // m * m


def _sigmoid_via_tanh(x):
    # sigmoid(x) = 0.5*tanh(0.5*x) + 0.5 : one EUP push instead of exp+rcp.
    return 0.5 * jnp.tanh(0.5 * x) + 0.5


def _vmem_capacity_bytes():
    try:
        return int(pltpu.get_tpu_info().vmem_capacity_bytes)
    except Exception:
        return 64 << 20   # conservative (v7x-sized) fallback


def _pick_batch_block(b_pad):
    """Batch rows per grid block: >=2 blocks when possible (megacore), <=64 rows."""
    if b_pad < 16:
        return b_pad
    for cand in (64, 32, 16, 8):
        if b_pad % cand == 0 and b_pad // cand >= 2:
            return cand
    return b_pad


def _make_lstm_kernel(seq_len, chunk, static_tail, unroll):
    """LSTM kernel processing `chunk` timesteps per (batch-block, time-chunk) grid step."""
    H = HIDDEN

    def kernel(x_ref, wih_ref, whh_ref, b_ref, wfc_ref, bfc_ref, out_ref,
               h_ref, c_ref, xproj_ref):
        ci = pl.program_id(1)                    # time-chunk index (sequential)
        bb = x_ref.shape[1]                      # batch rows in this block

        @pl.when(ci == 0)
        def _():
            h_ref[...] = jnp.zeros_like(h_ref)
            c_ref[...] = jnp.zeros_like(c_ref)

        # ---- bulk input projection: one big MXU matmul per chunk, bias folded ----
        x_flat = x_ref[...].reshape(chunk * bb, H)            # (tc*Bb, 128)
        xproj_ref[...] = (jnp.dot(x_flat, wih_ref[...],
                                  preferred_element_type=jnp.float32)
                          + b_ref[...])                        # (tc*Bb, 4H) f32

        w_hh = whh_ref[...]                                    # (H, 4H), loop-invariant

        def step(s, carry):
            h, c = carry
            start = pl.multiple_of(s * bb, bb)                 # Bb is a multiple of 8
            gates = (xproj_ref[pl.ds(start, bb), :]
                     + jnp.dot(h.astype(w_hh.dtype), w_hh,
                               preferred_element_type=jnp.float32))
            # PyTorch gate order: i, f, g, o
            i_g = _sigmoid_via_tanh(gates[:, 0 * H:1 * H])
            f_g = _sigmoid_via_tanh(gates[:, 1 * H:2 * H])
            g_g = jnp.tanh(gates[:, 2 * H:3 * H])
            o_g = _sigmoid_via_tanh(gates[:, 3 * H:4 * H])
            c_new = f_g * c + i_g * g_g
            h_new = o_g * jnp.tanh(c_new)
            return h_new, c_new

        if static_tail:
            # chunk divides seq_len: static trip count, (partially) unrolled.
            h, c = lax.fori_loop(0, chunk, step, (h_ref[...], c_ref[...]),
                                 unroll=unroll)
        else:
            # dynamic trip count skips padded tail timesteps entirely.
            steps = jnp.minimum(chunk, seq_len - ci * chunk)
            h, c = lax.fori_loop(0, steps, step, (h_ref[...], c_ref[...]))
        h_ref[...] = h
        c_ref[...] = c

        @pl.when(ci == pl.num_programs(1) - 1)
        def _():
            # Output block index only depends on the batch axis -> this single
            # write (lane-dense, class dim padded to 128) is what gets written back.
            logits = (jnp.dot(h.astype(wfc_ref.dtype), wfc_ref[...],
                              preferred_element_type=jnp.float32)
                      + bfc_ref[...])
            out_ref[...] = logits.astype(out_ref.dtype)

    return kernel


def text_lstm_forward(input_ids, params, *, matmul_dtype=jnp.bfloat16,
                      time_chunk=None):
    """input_ids: (B, T) int32. Returns logits (B, num_classes).

    matmul_dtype: dtype of MXU operands (x slab, gate & FC weights). Cell state,
    accumulation and all elementwise math stay f32.
    """
    H = HIDDEN
    B, T = input_ids.shape
    D = H

    # --- glue: embedding lookup, gathered directly in time-major order ---
    x_tm = jnp.take(params["embedding"], input_ids.T, axis=0)     # (T, B, D)
    x_tm = x_tm.astype(matmul_dtype)

    # --- pad batch to a sublane multiple so vregs / MXU rows are not idle ---
    B_pad = max(SUBLANES, _round_up(B, SUBLANES))
    if B_pad != B:
        x_tm = jnp.pad(x_tm, ((0, 0), (0, B_pad - B), (0, 0)))

    # --- batch blocking: >=2 blocks feeds both v7x TensorCores; <=64 rows keeps
    #     the (Bb, 512) gate tensor from spilling vregs in the serial loop ---
    bb = _pick_batch_block(B_pad)
    n_bblocks = B_pad // bb

    # --- time chunk sized from detected VMEM; budget covers the double-buffered
    #     x block AND the f32 xproj scratch (which grows 4x faster than x) ---
    vmem_cap = _vmem_capacity_bytes()
    x_dsize = jnp.dtype(matmul_dtype).itemsize
    per_step = 2 * bb * D * x_dsize + bb * 4 * H * 4
    budget = max(2 << 20, vmem_cap // 8)
    if time_chunk is None:
        time_chunk = max(1, budget // per_step)
    tc = max(1, min(int(time_chunk), T))

    # Prefer a chunk that divides T: static trip count -> unrollable inner loop.
    static_tail = (T % tc == 0)
    if not static_tail:
        for cand in range(tc, max(1, tc // 2) - 1, -1):
            if T % cand == 0:
                tc, static_tail = cand, True
                break
    n_chunks = pl.cdiv(T, tc)
    T_pad = n_chunks * tc
    if T_pad != T:
        x_tm = jnp.pad(x_tm, ((0, T_pad - T), (0, 0), (0, 0)))

    unroll = (True if tc <= 16 else 8) if static_tail else None

    # --- gate weights split (W_ih^T for the bulk projection, W_hh^T for the loop) ---
    w_ih_t = params["w_ih"].T.astype(matmul_dtype)                 # (D, 4H)
    w_hh_t = params["w_hh"].T.astype(matmul_dtype)                 # (H, 4H)
    b = (params["b_ih"] + params["b_hh"]).reshape(1, 4 * H).astype(jnp.float32)

    # --- FC padded to lane-dense width (128) so the final store is unmasked ---
    C = params["fc_b"].shape[0]
    C_pad = _round_up(max(C, LANES), LANES)
    wfc = jnp.zeros((H, C_pad), matmul_dtype).at[:, :C].set(
        params["fc_w"].T.astype(matmul_dtype))
    bfc = jnp.zeros((1, C_pad), jnp.float32).at[:, :C].set(
        params["fc_b"].astype(jnp.float32))

    # --- scoped VMEM limit: cover blocks + scratch with 2x headroom ---
    needed = (2 * tc * bb * D * x_dsize            # double-buffered x block
              + tc * bb * 4 * H * 4                # xproj scratch (f32)
              + 2 * bb * H * 4                     # h, c scratch
              + 2 * (D + H) * 4 * H * x_dsize      # gate weights (double-buffered)
              + 2 * (H + 1) * C_pad * 4            # fc weight/bias
              + 2 * bb * C_pad * 4)                # output block
    vmem_limit = int(min(vmem_cap * 3 // 4, max(2 * needed, 32 << 20)))

    kernel = _make_lstm_kernel(seq_len=T, chunk=tc,
                               static_tail=static_tail, unroll=unroll)

    out = pl.pallas_call(
        kernel,
        out_shape=jax.ShapeDtypeStruct((B_pad, C_pad), jnp.float32),
        grid_spec=pltpu.PrefetchScalarGridSpec(
            num_scalar_prefetch=0,
            grid=(n_bblocks, n_chunks),                      # (batch, time)
            in_specs=[
                pl.BlockSpec((tc, bb, D), lambda bi, ti: (ti, bi, 0)),   # x chunk
                pl.BlockSpec((D, 4 * H), lambda bi, ti: (0, 0)),         # W_ih^T
                pl.BlockSpec((H, 4 * H), lambda bi, ti: (0, 0)),         # W_hh^T
                pl.BlockSpec((1, 4 * H), lambda bi, ti: (0, 0)),         # fused bias
                pl.BlockSpec((H, C_pad), lambda bi, ti: (0, 0)),         # fc W (padded)
                pl.BlockSpec((1, C_pad), lambda bi, ti: (0, 0)),         # fc b (padded)
            ],
            out_specs=pl.BlockSpec((bb, C_pad), lambda bi, ti: (bi, 0)),
            scratch_shapes=[
                pltpu.VMEM((bb, H), jnp.float32),            # h (persists over time)
                pltpu.VMEM((bb, H), jnp.float32),            # c (persists over time)
                pltpu.VMEM((tc * bb, 4 * H), jnp.float32),   # xproj (per chunk)
            ],
        ),
        compiler_params=pltpu.CompilerParams(
            dimension_semantics=("parallel", "arbitrary"),   # batch || , time sequential
            vmem_limit_bytes=vmem_limit),
    )(x_tm, w_ih_t, w_hh_t, b, wfc, bfc)

    return out[:B, :C]


def reference_forward(input_ids, params):
    """Pure-JAX reference matching torch.nn.LSTM semantics (f32)."""
    H = HIDDEN
    x = jnp.take(params["embedding"], input_ids, axis=0)       # (B, T, D)
    B = x.shape[0]
    b = params["b_ih"] + params["b_hh"]

    def step(carry, x_t):
        h, c = carry
        gates = x_t @ params["w_ih"].T + h @ params["w_hh"].T + b
        i = jax.nn.sigmoid(gates[:, 0 * H:1 * H])
        f = jax.nn.sigmoid(gates[:, 1 * H:2 * H])
        g = jnp.tanh(gates[:, 2 * H:3 * H])
        o = jax.nn.sigmoid(gates[:, 3 * H:4 * H])
        c = f * c + i * g
        h = o * jnp.tanh(c)
        return (h, c), None

    h0 = jnp.zeros((B, H), jnp.float32)
    c0 = jnp.zeros((B, H), jnp.float32)
    (h, _), _ = jax.lax.scan(step, (h0, c0), jnp.swapaxes(x, 0, 1))
    return h @ params["fc_w"].T + params["fc_b"]


def init_params(key, vocab_size, num_classes):
    H = HIDDEN
    ks = jax.random.split(key, 7)
    bound = 1.0 / jnp.sqrt(H)
    return {
        "embedding": jax.random.normal(ks[0], (vocab_size, H), jnp.float32),
        "w_ih": jax.random.uniform(ks[1], (4 * H, H), jnp.float32, -bound, bound),
        "w_hh": jax.random.uniform(ks[2], (4 * H, H), jnp.float32, -bound, bound),
        "b_ih": jax.random.uniform(ks[3], (4 * H,), jnp.float32, -bound, bound),
        "b_hh": jax.random.uniform(ks[4], (4 * H,), jnp.float32, -bound, bound),
        "fc_w": jax.random.uniform(ks[5], (num_classes, H), jnp.float32, -bound, bound),
        "fc_b": jax.random.uniform(ks[6], (num_classes,), jnp.float32, -bound, bound),
    }


if __name__ == "__main__":
    key = jax.random.PRNGKey(0)
    vocab_size, num_classes = 100, 8
    batch, seq = 2, 8

    pkey, ikey = jax.random.split(key)
    params = init_params(pkey, vocab_size, num_classes)
    input_ids = jax.random.randint(ikey, (batch, seq), 0, vocab_size, dtype=jnp.int32)

    ref = jax.block_until_ready(reference_forward(input_ids, params))

    # f32 operands: tight parity with the f32 reference.
    out_f32 = jax.block_until_ready(
        text_lstm_forward(input_ids, params, matmul_dtype=jnp.float32))
    assert out_f32.shape == (batch, num_classes)
    assert jnp.allclose(out_f32, ref, rtol=1e-4, atol=1e-4), "f32 mismatch vs reference"

    # bf16 MXU operands (review-suggested v5e/v6e/v7x optimization): looser parity.
    out_bf16 = jax.block_until_ready(
        text_lstm_forward(input_ids, params, matmul_dtype=jnp.bfloat16))
    assert out_bf16.shape == (batch, num_classes)
    assert jnp.allclose(out_bf16, ref, rtol=1e-1, atol=1e-1), "bf16 mismatch vs reference"

    print("KERNEL_OK")
</pallas_src>

<mosaic_0001>
module attributes {stable_mosaic.version = 11 : i64} {
  func.func @kernel(%arg0: i32, %arg1: i32, %arg2: memref<8x8x128xf32, #tpu.memory_space<vmem>>, %arg3: memref<128x512xf32, #tpu.memory_space<vmem>>, %arg4: memref<128x512xf32, #tpu.memory_space<vmem>>, %arg5: memref<1x512xf32, #tpu.memory_space<vmem>>, %arg6: memref<128x128xf32, #tpu.memory_space<vmem>>, %arg7: memref<1x128xf32, #tpu.memory_space<vmem>>, %arg8: memref<8x128xf32, #tpu.memory_space<vmem>>, %arg9: memref<8x128xf32, #tpu.memory_space<vmem>>, %arg10: memref<8x128xf32, #tpu.memory_space<vmem>>, %arg11: memref<64x512xf32, #tpu.memory_space<vmem>>) attributes {dimension_semantics = [#tpu.dimension_semantics<parallel>, #tpu.dimension_semantics<arbitrary>], iteration_bounds = array<i64: 1, 1>, scalar_prefetch = 0 : i64, scratch_operands = 3 : i64, tpu.core_type = #tpu.core_type<tc>, window_params = [{transform_indices = @transform_0, window_bounds = array<i64: 8, 8, 128>}, {pipeline_mode = #tpu.pipeline_mode<synchronous>, transform_indices = @transform_1, window_bounds = array<i64: 128, 512>}, {pipeline_mode = #tpu.pipeline_mode<synchronous>, transform_indices = @transform_2, window_bounds = array<i64: 128, 512>}, {pipeline_mode = #tpu.pipeline_mode<synchronous>, transform_indices = @transform_3, window_bounds = array<i64: 1, 512>}, {pipeline_mode = #tpu.pipeline_mode<synchronous>, transform_indices = @transform_4, window_bounds = array<i64: 128, 128>}, {pipeline_mode = #tpu.pipeline_mode<synchronous>, transform_indices = @transform_5, window_bounds = array<i64: 1, 128>}, {transform_indices = @transform_6, window_bounds = array<i64: 8, 128>}]} {
    %c0_i32 = arith.constant 0 : i32
    %0 = arith.cmpi eq, %arg1, %c0_i32 : i32
    %1 = arith.extui %0 : i1 to i32
    %c0_i32_0 = arith.constant 0 : i32
    %2 = arith.cmpi ne, %1, %c0_i32_0 : i32
    scf.if %2 {
      %cst_118 = arith.constant 0.000000e+00 : f32
      %315 = vector.broadcast %cst_118 : f32 to vector<8x128xf32>
      %c0_119 = arith.constant 0 : index
      %c0_120 = arith.constant 0 : index
      %316 = vector.load %arg9[%c0_119, %c0_120] : memref<8x128xf32, #tpu.memory_space<vmem>>, vector<8x128xf32>
      tpu.vector_store %arg9[%c0_119, %c0_120], %315 {strides = array<i32>} : memref<8x128xf32, #tpu.memory_space<vmem>>, vector<8x128xf32>,
      %cst_121 = arith.constant 0.000000e+00 : f32
      %317 = vector.broadcast %cst_121 : f32 to vector<8x128xf32>
      %c0_122 = arith.constant 0 : index
      %c0_123 = arith.constant 0 : index
      %318 = vector.load %arg10[%c0_122, %c0_123] : memref<8x128xf32, #tpu.memory_space<vmem>>, vector<8x128xf32>
      tpu.vector_store %arg10[%c0_122, %c0_123], %317 {strides = array<i32>} : memref<8x128xf32, #tpu.memory_space<vmem>>, vector<8x128xf32>,
    } else {
    }
    %c0 = arith.constant 0 : index
    %c0_1 = arith.constant 0 : index
    %c0_2 = arith.constant 0 : index
    %3 = vector.load %arg2[%c0, %c0_1, %c0_2] : memref<8x8x128xf32, #tpu.memory_space<vmem>>, vector<8x8x128xf32>
    %4 = vector.shape_cast %3 : vector<8x8x128xf32> to vector<64x128xf32>
    %c0_3 = arith.constant 0 : index
    %c0_4 = arith.constant 0 : index
    %5 = vector.load %arg3[%c0_3, %c0_4] : memref<128x512xf32, #tpu.memory_space<vmem>>, vector<128x512xf32>
    %cst = arith.constant dense<0.000000e+00> : vector<64x512xf32>
    %6 = tpu.matmul %4, %5, %cst {dimension_numbers = #tpu.dot_dimension_numbers<[1], [0], [0], [1], [0, 0, 1, 1], [], []>} : vector<64x128xf32>, vector<128x512xf32>, vector<64x512xf32> -> vector<64x512xf32>
    %c0_5 = arith.constant 0 : index
    %c0_6 = arith.constant 0 : index
    %7 = vector.load %arg5[%c0_5, %c0_6] : memref<1x512xf32, #tpu.memory_space<vmem>>, vector<1x512xf32>
    %8 = vector.broadcast %7 : vector<1x512xf32> to vector<64x512xf32>
    %9 = arith.addf %6, %8 : vector<64x512xf32>
    %c0_7 = arith.constant 0 : index
    %c0_8 = arith.constant 0 : index
    %10 = vector.load %arg11[%c0_7, %c0_8] : memref<64x512xf32, #tpu.memory_space<vmem>>, vector<64x512xf32>
    tpu.vector_store %arg11[%c0_7, %c0_8], %9 {strides = array<i32>} : memref<64x512xf32, #tpu.memory_space<vmem>>, vector<64x512xf32>,
    %c0_9 = arith.constant 0 : index
    %c0_10 = arith.constant 0 : index
    %11 = vector.load %arg4[%c0_9, %c0_10] : memref<128x512xf32, #tpu.memory_space<vmem>>, vector<128x512xf32>
    %c0_11 = arith.constant 0 : index
    %c0_12 = arith.constant 0 : index
    %12 = vector.load %arg9[%c0_11, %c0_12] : memref<8x128xf32, #tpu.memory_space<vmem>>, vector<8x128xf32>
    %c0_13 = arith.constant 0 : index
    %c0_14 = arith.constant 0 : index
    %13 = vector.load %arg10[%c0_13, %c0_14] : memref<8x128xf32, #tpu.memory_space<vmem>>, vector<8x128xf32>
    %c0_i32_15 = arith.constant 0 : i32
    %c8_i32 = arith.constant 8 : i32
    %14 = arith.muli %c0_i32_15, %c8_i32 : i32
    %15 = tpu.assume_multiple %14, 8 : i32
    %16 = arith.index_cast %15 : i32 to index
    %c0_16 = arith.constant 0 : index
    %17 = vector.load %arg11[%16, %c0_16] : memref<64x512xf32, #tpu.memory_space<vmem>>, vector<8x512xf32>
    %cst_17 = arith.constant dense<0.000000e+00> : vector<8x512xf32>
    %18 = tpu.matmul %12, %11, %cst_17 {dimension_numbers = #tpu.dot_dimension_numbers<[1], [0], [0], [1], [0, 0, 1, 1], [], []>} : vector<8x128xf32>, vector<128x512xf32>, vector<8x512xf32> -> vector<8x512xf32>
    %19 = arith.addf %17, %18 : vector<8x512xf32>
    %20 = vector.extract_strided_slice %19 {offsets = [0, 0], sizes = [8, 128], strides = [1, 1]} : vector<8x512xf32> to vector<8x128xf32>
    %cst_18 = arith.constant 5.000000e-01 : f32
    %21 = vector.broadcast %cst_18 : f32 to vector<8x128xf32>
    %22 = arith.mulf %21, %20 : vector<8x128xf32>
    %23 = math.tanh %22 : vector<8x128xf32>
    %cst_19 = arith.constant 5.000000e-01 : f32
    %24 = vector.broadcast %cst_19 : f32 to vector<8x128xf32>
    %25 = arith.mulf %24, %23 : vector<8x128xf32>
    %cst_20 = arith.constant 5.000000e-01 : f32
    %26 = vector.broadcast %cst_20 : f32 to vector<8x128xf32>
    %27 = arith.addf %25, %26 : vector<8x128xf32>
    %28 = vector.extract_strided_slice %19 {offsets = [0, 128], sizes = [8, 128], strides = [1, 1]} : vector<8x512xf32> to vector<8x128xf32>
    %cst_21 = arith.constant 5.000000e-01 : f32
    %29 = vector.broadcast %cst_21 : f32 to vector<8x128xf32>
    %30 = arith.mulf %29, %28 : vector<8x128xf32>
    %31 = math.tanh %30 : vector<8x128xf32>
    %cst_22 = arith.constant 5.000000e-01 : f32
    %32 = vector.broadcast %cst_22 : f32 to vector<8x128xf32>
    %33 = arith.mulf %32, %31 : vector<8x128xf32>
    %cst_23 = arith.constant 5.000000e-01 : f32
    %34 = vector.broadcast %cst_23 : f32 to vector<8x128xf32>
    %35 = arith.addf %33, %34 : vector<8x128xf32>
    %36 = vector.extract_strided_slice %19 {offsets = [0, 256], sizes = [8, 128], strides = [1, 1]} : vector<8x512xf32> to vector<8x128xf32>
    %37 = math.tanh %36 : vector<8x128xf32>
    %38 = vector.extract_strided_slice %19 {offsets = [0, 384], sizes = [8, 128], strides = [1, 1]} : vector<8x512xf32> to vector<8x128xf32>
    %cst_24 = arith.constant 5.000000e-01 : f32
    %39 = vector.broadcast %cst_24 : f32 to vector<8x128xf32>
    %40 = arith.mulf %39, %38 : vector<8x128xf32>
    %41 = math.tanh %40 : vector<8x128xf32>
    %cst_25 = arith.constant 5.000000e-01 : f32
    %42 = vector.broadcast %cst_25 : f32 to vector<8x128xf32>
    %43 = arith.mulf %42, %41 : vector<8x128xf32>
    %cst_26 = arith.constant 5.000000e-01 : f32
    %44 = vector.broadcast %cst_26 : f32 to vector<8x128xf32>
    %45 = arith.addf %43, %44 : vector<8x128xf32>
    %46 = arith.mulf %35, %13 : vector<8x128xf32>
    %47 = arith.mulf %27, %37 : vector<8x128xf32>
    %48 = arith.addf %46, %47 : vector<8x128xf32>
    %49 = math.tanh %48 : vector<8x128xf32>
    %50 = arith.mulf %45, %49 : vector<8x128xf32>
    %c1_i32 = arith.constant 1 : i32
    %c8_i32_27 = arith.constant 8 : i32
    %51 = arith.muli %c1_i32, %c8_i32_27 : i32
    %52 = tpu.assume_multiple %51, 8 : i32
    %53 = arith.index_cast %52 : i32 to index
    %c0_28 = arith.constant 0 : index
    %54 = vector.load %arg11[%53, %c0_28] : memref<64x512xf32, #tpu.memory_space<vmem>>, vector<8x512xf32>
    %cst_29 = arith.constant dense<0.000000e+00> : vector<8x512xf32>
    %55 = tpu.matmul %50, %11, %cst_29 {dimension_numbers = #tpu.dot_dimension_numbers<[1], [0], [0], [1], [0, 0, 1, 1], [], []>} : vector<8x128xf32>, vector<128x512xf32>, vector<8x512xf32> -> vector<8x512xf32>
    %56 = arith.addf %54, %55 : vector<8x512xf32>
    %57 = vector.extract_strided_slice %56 {offsets = [0, 0], sizes = [8, 128], strides = [1, 1]} : vector<8x512xf32> to vector<8x128xf32>
    %cst_30 = arith.constant 5.000000e-01 : f32
    %58 = vector.broadcast %cst_30 : f32 to vector<8x128xf32>
    %59 = arith.mulf %58, %57 : vector<8x128xf32>
    %60 = math.tanh %59 : vector<8x128xf32>
    %cst_31 = arith.constant 5.000000e-01 : f32
    %61 = vector.broadcast %cst_31 : f32 to vector<8x128xf32>
    %62 = arith.mulf %61, %60 : vector<8x128xf32>
    %cst_32 = arith.constant 5.000000e-01 : f32
    %63 = vector.broadcast %cst_32 : f32 to vector<8x128xf32>
    %64 = arith.addf %62, %63 : vector<8x128xf32>
    %65 = vector.extract_strided_slice %56 {offsets = [0, 128], sizes = [8, 128], strides = [1, 1]} : vector<8x512xf32> to vector<8x128xf32>
    %cst_33 = arith.constant 5.000000e-01 : f32
    %66 = vector.broadcast %cst_33 : f32 to vector<8x128xf32>
    %67 = arith.mulf %66, %65 : vector<8x128xf32>
    %68 = math.tanh %67 : vector<8x128xf32>
    %cst_34 = arith.constant 5.000000e-01 : f32
    %69 = vector.broadcast %cst_34 : f32 to vector<8x128xf32>
    %70 = arith.mulf %69, %68 : vector<8x128xf32>
    %cst_35 = arith.constant 5.000000e-01 : f32
    %71 = vector.broadcast %cst_35 : f32 to vector<8x128xf32>
    %72 = arith.addf %70, %71 : vector<8x128xf32>
    %73 = vector.extract_strided_slice %56 {offsets = [0, 256], sizes = [8, 128], strides = [1, 1]} : vector<8x512xf32> to vector<8x128xf32>
    %74 = math.tanh %73 : vector<8x128xf32>
    %75 = vector.extract_strided_slice %56 {offsets = [0, 384], sizes = [8, 128], strides = [1, 1]} : vector<8x512xf32> to vector<8x128xf32>
    %cst_36 = arith.constant 5.000000e-01 : f32
    %76 = vector.broadcast %cst_36 : f32 to vector<8x128xf32>
    %77 = arith.mulf %76, %75 : vector<8x128xf32>
    %78 = math.tanh %77 : vector<8x128xf32>
    %cst_37 = arith.constant 5.000000e-01 : f32
    %79 = vector.broadcast %cst_37 : f32 to vector<8x128xf32>
    %80 = arith.mulf %79, %78 : vector<8x128xf32>
    %cst_38 = arith.constant 5.000000e-01 : f32
    %81 = vector.broadcast %cst_38 : f32 to vector<8x128xf32>
    %82 = arith.addf %80, %81 : vector<8x128xf32>
    %83 = arith.mulf %72, %48 : vector<8x128xf32>
    %84 = arith.mulf %64, %74 : vector<8x128xf32>
    %85 = arith.addf %83, %84 : vector<8x128xf32>
    %86 = math.tanh %85 : vector<8x128xf32>
    %87 = arith.mulf %82, %86 : vector<8x128xf32>
    %c2_i32 = arith.constant 2 : i32
    %c8_i32_39 = arith.constant 8 : i32
    %88 = arith.muli %c2_i32, %c8_i32_39 : i32
    %89 = tpu.assume_multiple %88, 8 : i32
    %90 = arith.index_cast %89 : i32 to index
    %c0_40 = arith.constant 0 : index
    %91 = vector.load %arg11[%90, %c0_40] : memref<64x512xf32, #tpu.memory_space<vmem>>, vector<8x512xf32>
    %cst_41 = arith.constant dense<0.000000e+00> : vector<8x512xf32>
    %92 = tpu.matmul %87, %11, %cst_41 {dimension_numbers = #tpu.dot_dimension_numbers<[1], [0], [0], [1], [0, 0, 1, 1], [], []>} : vector<8x128xf32>, vector<128x512xf32>, vector<8x512xf32> -> vector<8x512xf32>
    %93 = arith.addf %91, %92 : vector<8x512xf32>
    %94 = vector.extract_strided_slice %93 {offsets = [0, 0], sizes = [8, 128], strides = [1, 1]} : vector<8x512xf32> to vector<8x128xf32>
    %cst_42 = arith.constant 5.000000e-01 : f32
    %95 = vector.broadcast %cst_42 : f32 to vector<8x128xf32>
    %96 = arith.mulf %95, %94 : vector<8x128xf32>
    %97 = math.tanh %96 : vector<8x128xf32>
    %cst_43 = arith.constant 5.000000e-01 : f32
    %98 = vector.broadcast %cst_43 : f32 to vector<8x128xf32>
    %99 = arith.mulf %98, %97 : vector<8x128xf32>
    %cst_44 = arith.constant 5.000000e-01 : f32
    %100 = vector.broadcast %cst_44 : f32 to vector<8x128xf32>
    %101 = arith.addf %99, %100 : vector<8x128xf32>
    %102 = vector.extract_strided_slice %93 {offsets = [0, 128], sizes = [8, 128], strides = [1, 1]} : vector<8x512xf32> to vector<8x128xf32>
    %cst_45 = arith.constant 5.000000e-01 : f32
    %103 = vector.broadcast %cst_45 : f32 to vector<8x128xf32>
    %104 = arith.mulf %103, %102 : vector<8x128xf32>
    %105 = math.tanh %104 : vector<8x128xf32>
    %cst_46 = arith.constant 5.000000e-01 : f32
    %106 = vector.broadcast %cst_46 : f32 to vector<8x128xf32>
    %107 = arith.mulf %106, %105 : vector<8x128xf32>
    %cst_47 = arith.constant 5.000000e-01 : f32
    %108 = vector.broadcast %cst_47 : f32 to vector<8x128xf32>
    %109 = arith.addf %107, %108 : vector<8x128xf32>
    %110 = vector.extract_strided_slice %93 {offsets = [0, 256], sizes = [8, 128], strides = [1, 1]} : vector<8x512xf32> to vector<8x128xf32>
    %111 = math.tanh %110 : vector<8x128xf32>
    %112 = vector.extract_strided_slice %93 {offsets = [0, 384], sizes = [8, 128], strides = [1, 1]} : vector<8x512xf32> to vector<8x128xf32>
    %cst_48 = arith.constant 5.000000e-01 : f32
    %113 = vector.broadcast %cst_48 : f32 to vector<8x128xf32>
    %114 = arith.mulf %113, %112 : vector<8x128xf32>
    %115 = math.tanh %114 : vector<8x128xf32>
    %cst_49 = arith.constant 5.000000e-01 : f32
    %116 = vector.broadcast %cst_49 : f32 to vector<8x128xf32>
    %117 = arith.mulf %116, %115 : vector<8x128xf32>
    %cst_50 = arith.constant 5.000000e-01 : f32
    %118 = vector.broadcast %cst_50 : f32 to vector<8x128xf32>
    %119 = arith.addf %117, %118 : vector<8x128xf32>
    %120 = arith.mulf %109, %85 : vector<8x128xf32>
    %121 = arith.mulf %101, %111 : vector<8x128xf32>
    %122 = arith.addf %120, %121 : vector<8x128xf32>
    %123 = math.tanh %122 : vector<8x128xf32>
    %124 = arith.mulf %119, %123 : vector<8x128xf32>
    %c3_i32 = arith.constant 3 : i32
    %c8_i32_51 = arith.constant 8 : i32
    %125 = arith.muli %c3_i32, %c8_i32_51 : i32
    %126 = tpu.assume_multiple %125, 8 : i32
    %127 = arith.index_cast %126 : i32 to index
    %c0_52 = arith.constant 0 : index
    %128 = vector.load %arg11[%127, %c0_52] : memref<64x512xf32, #tpu.memory_space<vmem>>, vector<8x512xf32>
    %cst_53 = arith.constant dense<0.000000e+00> : vector<8x512xf32>
    %129 = tpu.matmul %124, %11, %cst_53 {dimension_numbers = #tpu.dot_dimension_numbers<[1], [0], [0], [1], [0, 0, 1, 1], [], []>} : vector<8x128xf32>, vector<128x512xf32>, vector<8x512xf32> -> vector<8x512xf32>
    %130 = arith.addf %128, %129 : vector<8x512xf32>
    %131 = vector.extract_strided_slice %130 {offsets = [0, 0], sizes = [8, 128], strides = [1, 1]} : vector<8x512xf32> to vector<8x128xf32>
    %cst_54 = arith.constant 5.000000e-01 : f32
    %132 = vector.broadcast %cst_54 : f32 to vector<8x128xf32>
    %133 = arith.mulf %132, %131 : vector<8x128xf32>
    %134 = math.tanh %133 : vector<8x128xf32>
    %cst_55 = arith.constant 5.000000e-01 : f32
    %135 = vector.broadcast %cst_55 : f32 to vector<8x128xf32>
    %136 = arith.mulf %135, %134 : vector<8x128xf32>
    %cst_56 = arith.constant 5.000000e-01 : f32
    %137 = vector.broadcast %cst_56 : f32 to vector<8x128xf32>
    %138 = arith.addf %136, %137 : vector<8x128xf32>
    %139 = vector.extract_strided_slice %130 {offsets = [0, 128], sizes = [8, 128], strides = [1, 1]} : vector<8x512xf32> to vector<8x128xf32>
    %cst_57 = arith.constant 5.000000e-01 : f32
    %140 = vector.broadcast %cst_57 : f32 to vector<8x128xf32>
    %141 = arith.mulf %140, %139 : vector<8x128xf32>
    %142 = math.tanh %141 : vector<8x128xf32>
    %cst_58 = arith.constant 5.000000e-01 : f32
    %143 = vector.broadcast %cst_58 : f32 to vector<8x128xf32>
    %144 = arith.mulf %143, %142 : vector<8x128xf32>
    %cst_59 = arith.constant 5.000000e-01 : f32
    %145 = vector.broadcast %cst_59 : f32 to vector<8x128xf32>
    %146 = arith.addf %144, %145 : vector<8x128xf32>
    %147 = vector.extract_strided_slice %130 {offsets = [0, 256], sizes = [8, 128], strides = [1, 1]} : vector<8x512xf32> to vector<8x128xf32>
    %148 = math.tanh %147 : vector<8x128xf32>
    %149 = vector.extract_strided_slice %130 {offsets = [0, 384], sizes = [8, 128], strides = [1, 1]} : vector<8x512xf32> to vector<8x128xf32>
    %cst_60 = arith.constant 5.000000e-01 : f32
    %150 = vector.broadcast %cst_60 : f32 to vector<8x128xf32>
    %151 = arith.mulf %150, %149 : vector<8x128xf32>
    %152 = math.tanh %151 : vector<8x128xf32>
    %cst_61 = arith.constant 5.000000e-01 : f32
    %153 = vector.broadcast %cst_61 : f32 to vector<8x128xf32>
    %154 = arith.mulf %153, %152 : vector<8x128xf32>
    %cst_62 = arith.constant 5.000000e-01 : f32
    %155 = vector.broadcast %cst_62 : f32 to vector<8x128xf32>
    %156 = arith.addf %154, %155 : vector<8x128xf32>
    %157 = arith.mulf %146, %122 : vector<8x128xf32>
    %158 = arith.mulf %138, %148 : vector<8x128xf32>
    %159 = arith.addf %157, %158 : vector<8x128xf32>
    %160 = math.tanh %159 : vector<8x128xf32>
    %161 = arith.mulf %156, %160 : vector<8x128xf32>
    %c4_i32 = arith.constant 4 : i32
    %c8_i32_63 = arith.constant 8 : i32
    %162 = arith.muli %c4_i32, %c8_i32_63 : i32
    %163 = tpu.assume_multiple %162, 8 : i32
    %164 = arith.index_cast %163 : i32 to index
    %c0_64 = arith.constant 0 : index
    %165 = vector.load %arg11[%164, %c0_64] : memref<64x512xf32, #tpu.memory_space<vmem>>, vector<8x512xf32>
    %cst_65 = arith.constant dense<0.000000e+00> : vector<8x512xf32>
    %166 = tpu.matmul %161, %11, %cst_65 {dimension_numbers = #tpu.dot_dimension_numbers<[1], [0], [0], [1], [0, 0, 1, 1], [], []>} : vector<8x128xf32>, vector<128x512xf32>, vector<8x512xf32> -> vector<8x512xf32>
    %167 = arith.addf %165, %166 : vector<8x512xf32>
    %168 = vector.extract_strided_slice %167 {offsets = [0, 0], sizes = [8, 128], strides = [1, 1]} : vector<8x512xf32> to vector<8x128xf32>
    %cst_66 = arith.constant 5.000000e-01 : f32
    %169 = vector.broadcast %cst_66 : f32 to vector<8x128xf32>
    %170 = arith.mulf %169, %168 : vector<8x128xf32>
    %171 = math.tanh %170 : vector<8x128xf32>
    %cst_67 = arith.constant 5.000000e-01 : f32
    %172 = vector.broadcast %cst_67 : f32 to vector<8x128xf32>
    %173 = arith.mulf %172, %171 : vector<8x128xf32>
    %cst_68 = arith.constant 5.000000e-01 : f32
    %174 = vector.broadcast %cst_68 : f32 to vector<8x128xf32>
    %175 = arith.addf %173, %174 : vector<8x128xf32>
    %176 = vector.extract_strided_slice %167 {offsets = [0, 128], sizes = [8, 128], strides = [1, 1]} : vector<8x512xf32> to vector<8x128xf32>
    %cst_69 = arith.constant 5.000000e-01 : f32
    %177 = vector.broadcast %cst_69 : f32 to vector<8x128xf32>
    %178 = arith.mulf %177, %176 : vector<8x128xf32>
    %179 = math.tanh %178 : vector<8x128xf32>
    %cst_70 = arith.constant 5.000000e-01 : f32
    %180 = vector.broadcast %cst_70 : f32 to vector<8x128xf32>
    %181 = arith.mulf %180, %179 : vector<8x128xf32>
    %cst_71 = arith.constant 5.000000e-01 : f32
    %182 = vector.broadcast %cst_71 : f32 to vector<8x128xf32>
    %183 = arith.addf %181, %182 : vector<8x128xf32>
    %184 = vector.extract_strided_slice %167 {offsets = [0, 256], sizes = [8, 128], strides = [1, 1]} : vector<8x512xf32> to vector<8x128xf32>
    %185 = math.tanh %184 : vector<8x128xf32>
    %186 = vector.extract_strided_slice %167 {offsets = [0, 384], sizes = [8, 128], strides = [1, 1]} : vector<8x512xf32> to vector<8x128xf32>
    %cst_72 = arith.constant 5.000000e-01 : f32
    %187 = vector.broadcast %cst_72 : f32 to vector<8x128xf32>
    %188 = arith.mulf %187, %186 : vector<8x128xf32>
    %189 = math.tanh %188 : vector<8x128xf32>
    %cst_73 = arith.constant 5.000000e-01 : f32
    %190 = vector.broadcast %cst_73 : f32 to vector<8x128xf32>
    %191 = arith.mulf %190, %189 : vector<8x128xf32>
    %cst_74 = arith.constant 5.000000e-01 : f32
    %192 = vector.broadcast %cst_74 : f32 to vector<8x128xf32>
    %193 = arith.addf %191, %192 : vector<8x128xf32>
    %194 = arith.mulf %183, %159 : vector<8x128xf32>
    %195 = arith.mulf %175, %185 : vector<8x128xf32>
    %196 = arith.addf %194, %195 : vector<8x128xf32>
    %197 = math.tanh %196 : vector<8x128xf32>
    %198 = arith.mulf %193, %197 : vector<8x128xf32>
    %c5_i32 = arith.constant 5 : i32
    %c8_i32_75 = arith.constant 8 : i32
    %199 = arith.muli %c5_i32, %c8_i32_75 : i32
    %200 = tpu.assume_multiple %199, 8 : i32
    %201 = arith.index_cast %200 : i32 to index
    %c0_76 = arith.constant 0 : index
    %202 = vector.load %arg11[%201, %c0_76] : memref<64x512xf32, #tpu.memory_space<vmem>>, vector<8x512xf32>
    %cst_77 = arith.constant dense<0.000000e+00> : vector<8x512xf32>
    %203 = tpu.matmul %198, %11, %cst_77 {dimension_numbers = #tpu.dot_dimension_numbers<[1], [0], [0], [1], [0, 0, 1, 1], [], []>} : vector<8x128xf32>, vector<128x512xf32>, vector<8x512xf32> -> vector<8x512xf32>
    %204 = arith.addf %202, %203 : vector<8x512xf32>
    %205 = vector.extract_strided_slice %204 {offsets = [0, 0], sizes = [8, 128], strides = [1, 1]} : vector<8x512xf32> to vector<8x128xf32>
    %cst_78 = arith.constant 5.000000e-01 : f32
    %206 = vector.broadcast %cst_78 : f32 to vector<8x128xf32>
    %207 = arith.mulf %206, %205 : vector<8x128xf32>
    %208 = math.tanh %207 : vector<8x128xf32>
    %cst_79 = arith.constant 5.000000e-01 : f32
    %209 = vector.broadcast %cst_79 : f32 to vector<8x128xf32>
    %210 = arith.mulf %209, %208 : vector<8x128xf32>
    %cst_80 = arith.constant 5.000000e-01 : f32
    %211 = vector.broadcast %cst_80 : f32 to vector<8x128xf32>
    %212 = arith.addf %210, %211 : vector<8x128xf32>
    %213 = vector.extract_strided_slice %204 {offsets = [0, 128], sizes = [8, 128], strides = [1, 1]} : vector<8x512xf32> to vector<8x128xf32>
    %cst_81 = arith.constant 5.000000e-01 : f32
    %214 = vector.broadcast %cst_81 : f32 to vector<8x128xf32>
    %215 = arith.mulf %214, %213 : vector<8x128xf32>
    %216 = math.tanh %215 : vector<8x128xf32>
    %cst_82 = arith.constant 5.000000e-01 : f32
    %217 = vector.broadcast %cst_82 : f32 to vector<8x128xf32>
    %218 = arith.mulf %217, %216 : vector<8x128xf32>
    %cst_83 = arith.constant 5.000000e-01 : f32
    %219 = vector.broadcast %cst_83 : f32 to vector<8x128xf32>
    %220 = arith.addf %218, %219 : vector<8x128xf32>
    %221 = vector.extract_strided_slice %204 {offsets = [0, 256], sizes = [8, 128], strides = [1, 1]} : vector<8x512xf32> to vector<8x128xf32>
    %222 = math.tanh %221 : vector<8x128xf32>
    %223 = vector.extract_strided_slice %204 {offsets = [0, 384], sizes = [8, 128], strides = [1, 1]} : vector<8x512xf32> to vector<8x128xf32>
    %cst_84 = arith.constant 5.000000e-01 : f32
    %224 = vector.broadcast %cst_84 : f32 to vector<8x128xf32>
    %225 = arith.mulf %224, %223 : vector<8x128xf32>
    %226 = math.tanh %225 : vector<8x128xf32>
    %cst_85 = arith.constant 5.000000e-01 : f32
    %227 = vector.broadcast %cst_85 : f32 to vector<8x128xf32>
    %228 = arith.mulf %227, %226 : vector<8x128xf32>
    %cst_86 = arith.constant 5.000000e-01 : f32
    %229 = vector.broadcast %cst_86 : f32 to vector<8x128xf32>
    %230 = arith.addf %228, %229 : vector<8x128xf32>
    %231 = arith.mulf %220, %196 : vector<8x128xf32>
    %232 = arith.mulf %212, %222 : vector<8x128xf32>
    %233 = arith.addf %231, %232 : vector<8x128xf32>
    %234 = math.tanh %233 : vector<8x128xf32>
    %235 = arith.mulf %230, %234 : vector<8x128xf32>
    %c6_i32 = arith.constant 6 : i32
    %c8_i32_87 = arith.constant 8 : i32
    %236 = arith.muli %c6_i32, %c8_i32_87 : i32
    %237 = tpu.assume_multiple %236, 8 : i32
    %238 = arith.index_cast %237 : i32 to index
    %c0_88 = arith.constant 0 : index
    %239 = vector.load %arg11[%238, %c0_88] : memref<64x512xf32, #tpu.memory_space<vmem>>, vector<8x512xf32>
    %cst_89 = arith.constant dense<0.000000e+00> : vector<8x512xf32>
    %240 = tpu.matmul %235, %11, %cst_89 {dimension_numbers = #tpu.dot_dimension_numbers<[1], [0], [0], [1], [0, 0, 1, 1], [], []>} : vector<8x128xf32>, vector<128x512xf32>, vector<8x512xf32> -> vector<8x512xf32>
    %241 = arith.addf %239, %240 : vector<8x512xf32>
    %242 = vector.extract_strided_slice %241 {offsets = [0, 0], sizes = [8, 128], strides = [1, 1]} : vector<8x512xf32> to vector<8x128xf32>
    %cst_90 = arith.constant 5.000000e-01 : f32
    %243 = vector.broadcast %cst_90 : f32 to vector<8x128xf32>
    %244 = arith.mulf %243, %242 : vector<8x128xf32>
    %245 = math.tanh %244 : vector<8x128xf32>
    %cst_91 = arith.constant 5.000000e-01 : f32
    %246 = vector.broadcast %cst_91 : f32 to vector<8x128xf32>
    %247 = arith.mulf %246, %245 : vector<8x128xf32>
    %cst_92 = arith.constant 5.000000e-01 : f32
    %248 = vector.broadcast %cst_92 : f32 to vector<8x128xf32>
    %249 = arith.addf %247, %248 : vector<8x128xf32>
    %250 = vector.extract_strided_slice %241 {offsets = [0, 128], sizes = [8, 128], strides = [1, 1]} : vector<8x512xf32> to vector<8x128xf32>
    %cst_93 = arith.constant 5.000000e-01 : f32
    %251 = vector.broadcast %cst_93 : f32 to vector<8x128xf32>
    %252 = arith.mulf %251, %250 : vector<8x128xf32>
    %253 = math.tanh %252 : vector<8x128xf32>
    %cst_94 = arith.constant 5.000000e-01 : f32
    %254 = vector.broadcast %cst_94 : f32 to vector<8x128xf32>
    %255 = arith.mulf %254, %253 : vector<8x128xf32>
    %cst_95 = arith.constant 5.000000e-01 : f32
    %256 = vector.broadcast %cst_95 : f32 to vector<8x128xf32>
    %257 = arith.addf %255, %256 : vector<8x128xf32>
    %258 = vector.extract_strided_slice %241 {offsets = [0, 256], sizes = [8, 128], strides = [1, 1]} : vector<8x512xf32> to vector<8x128xf32>
    %259 = math.tanh %258 : vector<8x128xf32>
    %260 = vector.extract_strided_slice %241 {offsets = [0, 384], sizes = [8, 128], strides = [1, 1]} : vector<8x512xf32> to vector<8x128xf32>
    %cst_96 = arith.constant 5.000000e-01 : f32
    %261 = vector.broadcast %cst_96 : f32 to vector<8x128xf32>
    %262 = arith.mulf %261, %260 : vector<8x128xf32>
    %263 = math.tanh %262 : vector<8x128xf32>
    %cst_97 = arith.constant 5.000000e-01 : f32
    %264 = vector.broadcast %cst_97 : f32 to vector<8x128xf32>
    %265 = arith.mulf %264, %263 : vector<8x128xf32>
    %cst_98 = arith.constant 5.000000e-01 : f32
    %266 = vector.broadcast %cst_98 : f32 to vector<8x128xf32>
    %267 = arith.addf %265, %266 : vector<8x128xf32>
    %268 = arith.mulf %257, %233 : vector<8x128xf32>
    %269 = arith.mulf %249, %259 : vector<8x128xf32>
    %270 = arith.addf %268, %269 : vector<8x128xf32>
    %271 = math.tanh %270 : vector<8x128xf32>
    %272 = arith.mulf %267, %271 : vector<8x128xf32>
    %c7_i32 = arith.constant 7 : i32
    %c8_i32_99 = arith.constant 8 : i32
    %273 = arith.muli %c7_i32, %c8_i32_99 : i32
    %274 = tpu.assume_multiple %273, 8 : i32
    %275 = arith.index_cast %274 : i32 to index
    %c0_100 = arith.constant 0 : index
    %276 = vector.load %arg11[%275, %c0_100] : memref<64x512xf32, #tpu.memory_space<vmem>>, vector<8x512xf32>
    %cst_101 = arith.constant dense<0.000000e+00> : vector<8x512xf32>
    %277 = tpu.matmul %272, %11, %cst_101 {dimension_numbers = #tpu.dot_dimension_numbers<[1], [0], [0], [1], [0, 0, 1, 1], [], []>} : vector<8x128xf32>, vector<128x512xf32>, vector<8x512xf32> -> vector<8x512xf32>
    %278 = arith.addf %276, %277 : vector<8x512xf32>
    %279 = vector.extract_strided_slice %278 {offsets = [0, 0], sizes = [8, 128], strides = [1, 1]} : vector<8x512xf32> to vector<8x128xf32>
    %cst_102 = arith.constant 5.000000e-01 : f32
    %280 = vector.broadcast %cst_102 : f32 to vector<8x128xf32>
    %281 = arith.mulf %280, %279 : vector<8x128xf32>
    %282 = math.tanh %281 : vector<8x128xf32>
    %cst_103 = arith.constant 5.000000e-01 : f32
    %283 = vector.broadcast %cst_103 : f32 to vector<8x128xf32>
    %284 = arith.mulf %283, %282 : vector<8x128xf32>
    %cst_104 = arith.constant 5.000000e-01 : f32
    %285 = vector.broadcast %cst_104 : f32 to vector<8x128xf32>
    %286 = arith.addf %284, %285 : vector<8x128xf32>
    %287 = vector.extract_strided_slice %278 {offsets = [0, 128], sizes = [8, 128], strides = [1, 1]} : vector<8x512xf32> to vector<8x128xf32>
    %cst_105 = arith.constant 5.000000e-01 : f32
    %288 = vector.broadcast %cst_105 : f32 to vector<8x128xf32>
    %289 = arith.mulf %288, %287 : vector<8x128xf32>
    %290 = math.tanh %289 : vector<8x128xf32>
    %cst_106 = arith.constant 5.000000e-01 : f32
    %291 = vector.broadcast %cst_106 : f32 to vector<8x128xf32>
    %292 = arith.mulf %291, %290 : vector<8x128xf32>
    %cst_107 = arith.constant 5.000000e-01 : f32
    %293 = vector.broadcast %cst_107 : f32 to vector<8x128xf32>
    %294 = arith.addf %292, %293 : vector<8x128xf32>
    %295 = vector.extract_strided_slice %278 {offsets = [0, 256], sizes = [8, 128], strides = [1, 1]} : vector<8x512xf32> to vector<8x128xf32>
    %296 = math.tanh %295 : vector<8x128xf32>
    %297 = vector.extract_strided_slice %278 {offsets = [0, 384], sizes = [8, 128], strides = [1, 1]} : vector<8x512xf32> to vector<8x128xf32>
    %cst_108 = arith.constant 5.000000e-01 : f32
    %298 = vector.broadcast %cst_108 : f32 to vector<8x128xf32>
    %299 = arith.mulf %298, %297 : vector<8x128xf32>
    %300 = math.tanh %299 : vector<8x128xf32>
    %cst_109 = arith.constant 5.000000e-01 : f32
    %301 = vector.broadcast %cst_109 : f32 to vector<8x128xf32>
    %302 = arith.mulf %301, %300 : vector<8x128xf32>
    %cst_110 = arith.constant 5.000000e-01 : f32
    %303 = vector.broadcast %cst_110 : f32 to vector<8x128xf32>
    %304 = arith.addf %302, %303 : vector<8x128xf32>
    %305 = arith.mulf %294, %270 : vector<8x128xf32>
    %306 = arith.mulf %286, %296 : vector<8x128xf32>
    %307 = arith.addf %305, %306 : vector<8x128xf32>
    %308 = math.tanh %307 : vector<8x128xf32>
    %309 = arith.mulf %304, %308 : vector<8x128xf32>
    %c8_i32_111 = arith.constant 8 : i32
    %c0_112 = arith.constant 0 : index
    %c0_113 = arith.constant 0 : index
    %310 = vector.load %arg9[%c0_112, %c0_113] : memref<8x128xf32, #tpu.memory_space<vmem>>, vector<8x128xf32>
    tpu.vector_store %arg9[%c0_112, %c0_113], %309 {strides = array<i32>} : memref<8x128xf32, #tpu.memory_space<vmem>>, vector<8x128xf32>,
    %c0_114 = arith.constant 0 : index
    %c0_115 = arith.constant 0 : index
    %311 = vector.load %arg10[%c0_114, %c0_115] : memref<8x128xf32, #tpu.memory_space<vmem>>, vector<8x128xf32>
    tpu.vector_store %arg10[%c0_114, %c0_115], %307 {strides = array<i32>} : memref<8x128xf32, #tpu.memory_space<vmem>>, vector<8x128xf32>,
    %c0_i32_116 = arith.constant 0 : i32
    %312 = arith.cmpi eq, %arg1, %c0_i32_116 : i32
    %313 = arith.extui %312 : i1 to i32
    %c0_i32_117 = arith.constant 0 : i32
    %314 = arith.cmpi ne, %313, %c0_i32_117 : i32
    scf.if %314 {
      %c0_118 = arith.constant 0 : index
      %c0_119 = arith.constant 0 : index
      %315 = vector.load %arg6[%c0_118, %c0_119] : memref<128x128xf32, #tpu.memory_space<vmem>>, vector<128x128xf32>
      %cst_120 = arith.constant dense<0.000000e+00> : vector<8x128xf32>
      %316 = tpu.matmul %309, %315, %cst_120 {dimension_numbers = #tpu.dot_dimension_numbers<[1], [0], [0], [1], [0, 0, 1, 1], [], []>} : vector<8x128xf32>, vector<128x128xf32>, vector<8x128xf32> -> vector<8x128xf32>
      %c0_121 = arith.constant 0 : index
      %c0_122 = arith.constant 0 : index
      %317 = vector.load %arg7[%c0_121, %c0_122] : memref<1x128xf32, #tpu.memory_space<vmem>>, vector<1x128xf32>
      %318 = vector.broadcast %317 : vector<1x128xf32> to vector<8x128xf32>
      %319 = arith.addf %316, %318 : vector<8x128xf32>
      %c0_123 = arith.constant 0 : index
      %c0_124 = arith.constant 0 : index
      %320 = vector.load %arg8[%c0_123, %c0_124] : memref<8x128xf32, #tpu.memory_space<vmem>>, vector<8x128xf32>
      tpu.vector_store %arg8[%c0_123, %c0_124], %319 {strides = array<i32>} : memref<8x128xf32, #tpu.memory_space<vmem>>, vector<8x128xf32>,
    } else {
    }
    return
  }
  func.func @transform_0(%arg0: i32, %arg1: i32) -> (i32, i32, i32) {
    %c0_i32 = arith.constant 0 : i32
    %c0_i32_0 = arith.constant 0 : i32
    return %arg1, %arg0, %c0_i32 : i32, i32, i32
  }
  func.func @transform_1(%arg0: i32, %arg1: i32) -> (i32, i32) {
    %c0_i32 = arith.constant 0 : i32
    %c0_i32_0 = arith.constant 0 : i32
    %c0_i32_1 = arith.constant 0 : i32
    return %c0_i32, %c0_i32_0 : i32, i32
  }
  func.func @transform_2(%arg0: i32, %arg1: i32) -> (i32, i32) {
    %c0_i32 = arith.constant 0 : i32
    %c0_i32_0 = arith.constant 0 : i32
    %c0_i32_1 = arith.constant 0 : i32
    return %c0_i32, %c0_i32_0 : i32, i32
  }
  func.func @transform_3(%arg0: i32, %arg1: i32) -> (i32, i32) {
    %c0_i32 = arith.constant 0 : i32
    %c0_i32_0 = arith.constant 0 : i32
    %c0_i32_1 = arith.constant 0 : i32
    return %c0_i32, %c0_i32_0 : i32, i32
  }
  func.func @transform_4(%arg0: i32, %arg1: i32) -> (i32, i32) {
    %c0_i32 = arith.constant 0 : i32
    %c0_i32_0 = arith.constant 0 : i32
    %c0_i32_1 = arith.constant 0 : i32
    return %c0_i32, %c0_i32_0 : i32, i32
  }
  func.func @transform_5(%arg0: i32, %arg1: i32) -> (i32, i32) {
    %c0_i32 = arith.constant 0 : i32
    %c0_i32_0 = arith.constant 0 : i32
    %c0_i32_1 = arith.constant 0 : i32
    return %c0_i32, %c0_i32_0 : i32, i32
  }
  func.func @transform_6(%arg0: i32, %arg1: i32) -> (i32, i32) {
    %c0_i32 = arith.constant 0 : i32
    %c0_i32_0 = arith.constant 0 : i32
    return %arg0, %c0_i32 : i32, i32
  }
}

</mosaic_0001>

<bundles_post_ra>
// kernel: tpu_custom_call.1
= control target key start
LH: loop header
LB: loop body
LE: loop exit
PB: predicated region body
PF: predicated region fallthrough
CT: control target
= control target key end

     0   :  { %11 = vsyncpa [#allocation6], 0  ;;  %s2667_s0 = inlined_call_operand.hbm [shape: f32[8,8,128], index: 0, kind: input, shape index: {}]   ;;  %s2668_s1 = inlined_call_operand.hbm [shape: f32[128,512], index: 1, kind: input, shape index: {}]   ;;  %s2669_s2 = inlined_call_operand.hbm [shape: f32[128,512], index: 2, kind: input, shape index: {}]   ;;  %s2670_s3 = inlined_call_operand.hbm [shape: f32[1,512], index: 3, kind: input, shape index: {}]   ;;  %s2671_s4 = inlined_call_operand.hbm [shape: f32[128,128], index: 4, kind: input, shape index: {}]   ;;  %s2672_s5 = inlined_call_operand.vmem [shape: f32[1,128], index: 5, kind: input, shape index: {}]   ;;  %s2673_s6 = inlined_call_operand.hbm [shape: f32[8,128], index: 6, kind: output, shape index: {}]  }
   0x1   :  { %12 = vsyncpa [#allocation9], 0 }
   0x2   :  { %13 = vsyncpa [#allocation12], 0  ;;  %s32_s23 = sshll.u32 %s2668_s1, 4  ;;  %s33_s23 = int_to_ptr.hbm [resolvable:$true] %s32_s23 }
   0x3   :  { %14 = vsyncpa [#allocation7], 0  ;;  %s1702_s24 = smov [#allocation8]   ;;  %s59_s28 = sshll.u32 %s2670_s3, 4  ;;  %s60_s28 = int_to_ptr.hbm [resolvable:$true] %s59_s28 }
   0x4   :  { %s34_s25 = sshll.u32 %s1702_s24, 4  ;;  %s1703_s29 = smov 512   ;;  %s35_s25 = int_to_ptr.vmem [resolvable:$true] %s34_s25 }
   0x5   :  { %s1704_s30 = smov 32   ;;  %s1705_s7 = smov [#allocation11]  }
   0x6   :  { %40 = dma.hbm_to_vmem [thread:$0]  %s33_s23, 8192, %s35_s25, [#allocation9], %s1703_s29, %s1703_s29, %s1704_s30  }
   0x7   :  { %s61_s8 = sshll.u32 %s1705_s7, 4  ;;  %s19_s11 = sshll.u32 %s2667_s0, 4  ;;  %s62_s8 = int_to_ptr.vmem [resolvable:$true] %s61_s8  ;;  %s20_s11 = int_to_ptr.hbm [resolvable:$true] %s19_s11 }
   0x8   :  { %64 = dma.hbm_to_vmem [thread:$0]  %s60_s28, 64, %s62_s8, [#allocation12]  }
   0x9   :  { %s1706_s1 = smov [#allocation5]   ;;  %s45_s3 = sshll.u32 %s2669_s2, 4  ;;  %s46_s3 = int_to_ptr.hbm [resolvable:$true] %s45_s3 }
   0xa   :  { %s21_s12 = sshll.u32 %s1706_s1, 4  ;;  %s1707_s15 = smov 128   ;;  %s22_s12 = int_to_ptr.vmem [resolvable:$true] %s21_s12 }
   0xb   :  { %s1708_s16 = smov 8   ;;  %s1709_s17 = smov [#allocation10]  }
   0xc   :  { %27 = dma.hbm_to_vmem [thread:$0]  %s20_s11, 1024, %s22_s12, [#allocation6], %s1707_s15, %s1707_s15, %s1708_s16  }
   0xd   :  { %s47_s18 = sshll.u32 %s1709_s17, 4  ;;  %s69_s0 = sshll.u32 %s2671_s4, 4  ;;  %s48_s18 = int_to_ptr.vmem [resolvable:$true] %s47_s18  ;;  %s70_s0 = int_to_ptr.hbm [resolvable:$true] %s69_s0 }
   0xe   :  { %53 = dma.hbm_to_vmem [thread:$0]  %s46_s3, 8192, %s48_s18, [#allocation9], %s1703_s29, %s1703_s29, %s1704_s30  }
   0xf   :  { %s1710_s21 = smov [#allocation13]  }
  0x10   :  { %s71_s22 = sshll.u32 %s1710_s21, 4  ;;  %s72_s22 = int_to_ptr.vmem [resolvable:$true] %s71_s22 }
  0x11   :  { %77 = dma.hbm_to_vmem [thread:$0]  %s70_s0, 2048, %s72_s22, [#allocation12], %s1707_s15, %s1707_s15, %s1708_s16  }
  0x12   :  { %1694 = dma.done.wait [#allocation6], 1024  }
  0x13   :  { %1695 = vsyncadd [#allocation6], 4294966272 }
  0x14   :  { %1696 = dma.done.wait [#allocation9], 16384  }
  0x15   :  { %1697 = vsyncadd [#allocation9], 4294950912 }
  0x16   :  { %1698 = dma.done.wait [#allocation12], 2112  }
  0x17   :  { %1699 = vsyncadd [#allocation12], 4294965184  ;;  %v174_v0 = vld [vmem:[#allocation8 + $0x1e0] sm:$0xff]  ;;  %v175_v1 = vld [vmem:[#allocation8 + $0x1e8] sm:$0xff]  ;;  %s1712_s23 = smov [#allocation14]   ;;  %s1375_s27 = sshll.u32 %s2673_s6, 4  ;;  %s1376_s27 = int_to_ptr.hbm [resolvable:$true] %s1375_s27 }
  0x18   :  { %v176_v2 = vld [vmem:[#allocation8 + $0x1f0] sm:$0xff]  ;;  %188 = vmatpush.msra.mxu0 %v174_v0  ;;  %229 = vmatpush.msra.mxu1 %v175_v1  ;;  %v177_v3 = vld [vmem:[#allocation8 + $0x1f8] sm:$0xff]  ;;  %v170_v4 = vld [vmem:[#allocation8 + $0x1c0] sm:$0xff]  ;;  %s1373_s24 = sshll.u32 %s1712_s23, 4  ;;  %s1374_s24 = int_to_ptr.vmem [resolvable:$true] %s1373_s24 }
  0x19   :  { %v171_v5 = vld [vmem:[#allocation8 + $0x1c8] sm:$0xff]  ;;  %270 = vmatpush.msra.mxu2 %v176_v2  ;;  %311 = vmatpush.msra.mxu3 %v177_v3  ;;  %v172_v6 = vld [vmem:[#allocation8 + $0x1d0] sm:$0xff]  ;;  %v173_v7 = vld [vmem:[#allocation8 + $0x1d8] sm:$0xff] }
  0x1a   :  { %v166_v8 = vld [vmem:[#allocation8 + $0x1a0] sm:$0xff]  ;;  %189 = vmatpush.msra.mxu0 %v170_v4  ;;  %230 = vmatpush.msra.mxu1 %v171_v5  ;;  %v167_v9 = vld [vmem:[#allocation8 + $0x1a8] sm:$0xff]  ;;  %v168_v10 = vld [vmem:[#allocation8 + $0x1b0] sm:$0xff] }
  0x1b   :  { %v169_v11 = vld [vmem:[#allocation8 + $0x1b8] sm:$0xff]  ;;  %271 = vmatpush.msra.mxu2 %v172_v6  ;;  %312 = vmatpush.msra.mxu3 %v173_v7  ;;  %v162_v12 = vld [vmem:[#allocation8 + $0x180] sm:$0xff]  ;;  %v163_v13 = vld [vmem:[#allocation8 + $0x188] sm:$0xff] }
  0x1c   :  { %190 = vmatpush.msra.mxu0 %v166_v8  ;;  %231 = vmatpush.msra.mxu1 %v167_v9  ;;  %v164_v14 = vld [vmem:[#allocation8 + $0x190] sm:$0xff]  ;;  %v165_v15 = vld [vmem:[#allocation8 + $0x198] sm:$0xff]  ;;  %v158_v16 = vld [vmem:[#allocation8 + $0x160] sm:$0xff] }
  0x1d   :  { %272 = vmatpush.msra.mxu2 %v168_v10  ;;  %313 = vmatpush.msra.mxu3 %v169_v11  ;;  %v159_v17 = vld [vmem:[#allocation8 + $0x168] sm:$0xff]  ;;  %v160_v18 = vld [vmem:[#allocation8 + $0x170] sm:$0xff]  ;;  %v161_v19 = vld [vmem:[#allocation8 + $0x178] sm:$0xff] }
  0x1e   :  { %191 = vmatpush.msra.mxu0 %v162_v12  ;;  %232 = vmatpush.msra.mxu1 %v163_v13  ;;  %v154_v20 = vld [vmem:[#allocation8 + $0x140] sm:$0xff]  ;;  %v155_v21 = vld [vmem:[#allocation8 + $0x148] sm:$0xff]  ;;  %v156_v22 = vld [vmem:[#allocation8 + $0x150] sm:$0xff] }
  0x1f   :  { %273 = vmatpush.msra.mxu2 %v164_v14  ;;  %314 = vmatpush.msra.mxu3 %v165_v15  ;;  %v157_v23 = vld [vmem:[#allocation8 + $0x158] sm:$0xff]  ;;  %v150_v24 = vld [vmem:[#allocation8 + $0x120] sm:$0xff]  ;;  %v151_v25 = vld [vmem:[#allocation8 + $0x128] sm:$0xff] }
  0x20   :  { %192 = vmatpush.msra.mxu0 %v158_v16  ;;  %233 = vmatpush.msra.mxu1 %v159_v17  ;;  %v152_v26 = vld [vmem:[#allocation8 + $0x130] sm:$0xff]  ;;  %v153_v27 = vld [vmem:[#allocation8 + $0x138] sm:$0xff]  ;;  %v146_v28 = vld [vmem:[#allocation8 + $0x100] sm:$0xff] }
  0x21   :  { %274 = vmatpush.msra.mxu2 %v160_v18  ;;  %315 = vmatpush.msra.mxu3 %v161_v19  ;;  %v147_v29 = vld [vmem:[#allocation8 + $0x108] sm:$0xff]  ;;  %v148_v30 = vld [vmem:[#allocation8 + $0x110] sm:$0xff]  ;;  %v149_v31 = vld [vmem:[#allocation8 + $0x118] sm:$0xff] }
  0x22   :  { %193 = vmatpush.msra.mxu0 %v154_v20  ;;  %234 = vmatpush.msra.mxu1 %v155_v21  ;;  %v142_v32 = vld [vmem:[#allocation8 + $0xe0] sm:$0xff]  ;;  %v143_v33 = vld [vmem:[#allocation8 + $0xe8] sm:$0xff]  ;;  %v144_v34 = vld [vmem:[#allocation8 + $0xf0] sm:$0xff] }
  0x23   :  { %275 = vmatpush.msra.mxu2 %v156_v22  ;;  %316 = vmatpush.msra.mxu3 %v157_v23  ;;  %v145_v35 = vld [vmem:[#allocation8 + $0xf8] sm:$0xff]  ;;  %v138_v36 = vld [vmem:[#allocation8 + $0xc0] sm:$0xff]  ;;  %v139_v37 = vld [vmem:[#allocation8 + $0xc8] sm:$0xff] }
  0x24   :  { %194 = vmatpush.msra.mxu0 %v150_v24  ;;  %235 = vmatpush.msra.mxu1 %v151_v25  ;;  %v140_v38 = vld [vmem:[#allocation8 + $0xd0] sm:$0xff]  ;;  %v141_v39 = vld [vmem:[#allocation8 + $0xd8] sm:$0xff]  ;;  %v134_v40 = vld [vmem:[#allocation8 + $0xa0] sm:$0xff] }
  0x25   :  { %276 = vmatpush.msra.mxu2 %v152_v26  ;;  %317 = vmatpush.msra.mxu3 %v153_v27  ;;  %v135_v41 = vld [vmem:[#allocation8 + $0xa8] sm:$0xff]  ;;  %v136_v42 = vld [vmem:[#allocation8 + $0xb0] sm:$0xff]  ;;  %v137_v43 = vld [vmem:[#allocation8 + $0xb8] sm:$0xff] }
  0x26   :  { %195 = vmatpush.msra.mxu0 %v146_v28  ;;  %236 = vmatpush.msra.mxu1 %v147_v29  ;;  %v130_v44 = vld [vmem:[#allocation8 + $0x80] sm:$0xff]  ;;  %v131_v45 = vld [vmem:[#allocation8 + $0x88] sm:$0xff]  ;;  %v132_v46 = vld [vmem:[#allocation8 + $0x90] sm:$0xff] }
  0x27   :  { %277 = vmatpush.msra.mxu2 %v148_v30  ;;  %318 = vmatpush.msra.mxu3 %v149_v31  ;;  %v133_v47 = vld [vmem:[#allocation8 + $0x98] sm:$0xff]  ;;  %v126_v48 = vld [vmem:[#allocation8 + $0x60] sm:$0xff]  ;;  %v127_v49 = vld [vmem:[#allocation8 + $0x68] sm:$0xff] }
  0x28   :  { %196 = vmatpush.msra.mxu0 %v142_v32  ;;  %237 = vmatpush.msra.mxu1 %v143_v33  ;;  %v128_v50 = vld [vmem:[#allocation8 + $0x70] sm:$0xff]  ;;  %v129_v51 = vld [vmem:[#allocation8 + $0x78] sm:$0xff]  ;;  %v122_v52 = vld [vmem:[#allocation8 + $0x40] sm:$0xff] }
  0x29   :  { %278 = vmatpush.msra.mxu2 %v144_v34  ;;  %319 = vmatpush.msra.mxu3 %v145_v35  ;;  %v123_v53 = vld [vmem:[#allocation8 + $0x48] sm:$0xff]  ;;  %v124_v54 = vld [vmem:[#allocation8 + $0x50] sm:$0xff]  ;;  %v125_v55 = vld [vmem:[#allocation8 + $0x58] sm:$0xff] }
  0x2a   :  { %197 = vmatpush.msra.mxu0 %v138_v36  ;;  %238 = vmatpush.msra.mxu1 %v139_v37  ;;  %v118_v56 = vld [vmem:[#allocation8 + $0x20] sm:$0xff]  ;;  %v119_v57 = vld [vmem:[#allocation8 + $0x28] sm:$0xff]  ;;  %v120_v58 = vld [vmem:[#allocation8 + $0x30] sm:$0xff] }
  0x2b   :  { %279 = vmatpush.msra.mxu2 %v140_v38  ;;  %320 = vmatpush.msra.mxu3 %v141_v39  ;;  %v121_v59 = vld [vmem:[#allocation8 + $0x38] sm:$0xff]  ;;  %v114_v60 = vld [vmem:[#allocation8] sm:$0xff]  ;;  %v115_v61 = vld [vmem:[#allocation8 + $0x8] sm:$0xff] }
  0x2c   :  { %198 = vmatpush.msra.mxu0 %v134_v40  ;;  %239 = vmatpush.msra.mxu1 %v135_v41  ;;  %v116_v62 = vld [vmem:[#allocation8 + $0x10] sm:$0xff]  ;;  %v117_v63 = vld [vmem:[#allocation8 + $0x18] sm:$0xff]  ;;  %v106_v0 = vld [vmem:[#allocation5] sm:$0xff] }
  0x2d   :  { %280 = vmatpush.msra.mxu2 %v136_v42  ;;  %321 = vmatpush.msra.mxu3 %v137_v43  ;;  %v1763_v1 = vld [vmem:[#allocation10 + $0x1e0] sm:$0xff]  ;;  %v1765_v2 = vld [vmem:[#allocation10 + $0x1e8] sm:$0xff]  ;;  %v1767_v3 = vld [vmem:[#allocation10 + $0x1f0] sm:$0xff] }
  0x2e   :  { %199 = vmatpush.msra.mxu0 %v130_v44  ;;  %240 = vmatpush.msra.mxu1 %v131_v45  ;;  %v1769_v4 = vld [vmem:[#allocation10 + $0x1f8] sm:$0xff]  ;;  %v1771_v5 = vld [vmem:[#allocation10 + $0x1c0] sm:$0xff]  ;;  %v1773_v6 = vld [vmem:[#allocation10 + $0x1c8] sm:$0xff] }
  0x2f   :  { %281 = vmatpush.msra.mxu2 %v132_v46  ;;  %322 = vmatpush.msra.mxu3 %v133_v47  ;;  %v1777_v7 = vld [vmem:[#allocation10 + $0x1d0] sm:$0xff]  ;;  %v1779_v8 = vld [vmem:[#allocation10 + $0x1d8] sm:$0xff]  ;;  %v1783_v9 = vld [vmem:[#allocation10 + $0x1a0] sm:$0xff] }
  0x30   :  { %200 = vmatpush.msra.mxu0 %v126_v48  ;;  %241 = vmatpush.msra.mxu1 %v127_v49  ;;  %v1785_v10 = vld [vmem:[#allocation10 + $0x1a8] sm:$0xff]  ;;  %v1789_v11 = vld [vmem:[#allocation10 + $0x1b0] sm:$0xff]  ;;  %v1791_v12 = vld [vmem:[#allocation10 + $0x1b8] sm:$0xff] }
  0x31   :  { %282 = vmatpush.msra.mxu2 %v128_v50  ;;  %323 = vmatpush.msra.mxu3 %v129_v51  ;;  %v107_v13 = vld [vmem:[#allocation5 + $0x8] sm:$0xff]  ;;  %v1798_v14 = vld [vmem:[#allocation10 + $0x180] sm:$0xff]  ;;  %v1803_v16 = vld [vmem:[#allocation10 + $0x190] sm:$0xff] }
  0x32   :  { %201 = vmatpush.msra.mxu0 %v122_v52  ;;  %242 = vmatpush.msra.mxu1 %v123_v53  ;;  %v1800_v15 = vld [vmem:[#allocation10 + $0x188] sm:$0xff]  ;;  %v1805_v17 = vld [vmem:[#allocation10 + $0x198] sm:$0xff]  ;;  %v1807_v18 = vld [vmem:[#allocation10 + $0x160] sm:$0xff] }
  0x33   :  { %283 = vmatpush.msra.mxu2 %v124_v54  ;;  %324 = vmatpush.msra.mxu3 %v125_v55  ;;  %v1809_v19 = vld [vmem:[#allocation10 + $0x168] sm:$0xff]  ;;  %v1813_v20 = vld [vmem:[#allocation10 + $0x170] sm:$0xff]  ;;  %v1815_v21 = vld [vmem:[#allocation10 + $0x178] sm:$0xff] }
  0x34   :  { %202 = vmatpush.msra.mxu0 %v118_v56  ;;  %243 = vmatpush.msra.mxu1 %v119_v57  ;;  %v1819_v22 = vld [vmem:[#allocation10 + $0x140] sm:$0xff]  ;;  %v1821_v23 = vld [vmem:[#allocation10 + $0x148] sm:$0xff]  ;;  %v1825_v24 = vld [vmem:[#allocation10 + $0x150] sm:$0xff] }
  0x35   :  { %284 = vmatpush.msra.mxu2 %v120_v58  ;;  %325 = vmatpush.msra.mxu3 %v121_v59  ;;  %v1827_v25 = vld [vmem:[#allocation10 + $0x158] sm:$0xff]  ;;  %v108_v26 = vld [vmem:[#allocation5 + $0x10] sm:$0xff]  ;;  %v1834_v27 = vld [vmem:[#allocation10 + $0x120] sm:$0xff] }
  0x36   :  { %203 = vmatpush.msra.mxu0 %v114_v60  ;;  %244 = vmatpush.msra.mxu1 %v115_v61  ;;  %v1836_v28 = vld [vmem:[#allocation10 + $0x128] sm:$0xff]  ;;  %v1839_v29 = vld [vmem:[#allocation10 + $0x130] sm:$0xff]  ;;  %v1841_v30 = vld [vmem:[#allocation10 + $0x138] sm:$0xff] }
  0x37   :  { %285 = vmatpush.msra.mxu2 %v116_v62  ;;  %326 = vmatpush.msra.mxu3 %v117_v63  ;;  %v1843_v31 = vld [vmem:[#allocation10 + $0x100] sm:$0xff]  ;;  %v1845_v32 = vld [vmem:[#allocation10 + $0x108] sm:$0xff]  ;;  %v1849_v33 = vld [vmem:[#allocation10 + $0x110] sm:$0xff] }
  0x38   :  { %204 = vmatmul.f32.vlgmr.msra.gmra.mxu0 %v106_v0  ;;  %245 = vmatmul.f32.vlgmr.msra.gmra.mxu1 %v106_v0  ;;  %v1851_v34 = vld [vmem:[#allocation10 + $0x118] sm:$0xff]  ;;  %v1855_v35 = vld [vmem:[#allocation10 + $0xe0] sm:$0xff]  ;;  %v1857_v36 = vld [vmem:[#allocation10 + $0xe8] sm:$0xff] }
  0x39   :  { %286 = vmatmul.f32.vlgmr.msra.gmra.mxu2 %v106_v0  ;;  %327 = vmatmul.f32.vlgmr.msra.gmra.mxu3 %v106_v0  ;;  %v1861_v37 = vld [vmem:[#allocation10 + $0xf0] sm:$0xff]  ;;  %v1863_v38 = vld [vmem:[#allocation10 + $0xf8] sm:$0xff]  ;;  %v1870_v40 = vld [vmem:[#allocation10 + $0xc0] sm:$0xff] }
  0x3a   :  { %457 = vmatpush.msrb.mxu0 %v1763_v1  ;;  %477 = vmatpush.msrb.mxu1 %v1765_v2  ;;  %v109_v39 = vld [vmem:[#allocation5 + $0x18] sm:$0xff]  ;;  %v1872_v41 = vld [vmem:[#allocation10 + $0xc8] sm:$0xff]  ;;  %v1875_v42 = vld [vmem:[#allocation10 + $0xd0] sm:$0xff] }
  0x3b   :  { %497 = vmatpush.msrb.mxu2 %v1767_v3  ;;  %517 = vmatpush.msrb.mxu3 %v1769_v4  ;;  %v1877_v43 = vld [vmem:[#allocation10 + $0xd8] sm:$0xff]  ;;  %v1879_v44 = vld [vmem:[#allocation10 + $0xa0] sm:$0xff]  ;;  %v1881_v45 = vld [vmem:[#allocation10 + $0xa8] sm:$0xff] }
  0x3c   :  { %458 = vmatpush.msrb.mxu0 %v1771_v5  ;;  %478 = vmatpush.msrb.mxu1 %v1773_v6  ;;  %2764 = vst [vmem:[#allocation19_spill] sm:$0xff] %v1879_v44  ;;  %v1885_v46 = vld [vmem:[#allocation10 + $0xb0] sm:$0xff]  ;;  %v1887_v47 = vld [vmem:[#allocation10 + $0xb8] sm:$0xff]  ;;  %v1891_v48 = vld [vmem:[#allocation10 + $0x80] sm:$0xff] }
  0x3d   :  { %498 = vmatpush.msrb.mxu2 %v1777_v7  ;;  %518 = vmatpush.msrb.mxu3 %v1779_v8  ;;  %2765 = vst [vmem:[#allocation20_spill] sm:$0xff] %v1881_v45  ;;  %v1893_v49 = vld [vmem:[#allocation10 + $0x88] sm:$0xff]  ;;  %v1897_v50 = vld [vmem:[#allocation10 + $0x90] sm:$0xff]  ;;  %v1899_v51 = vld [vmem:[#allocation10 + $0x98] sm:$0xff] }
  0x3e   :  { %459 = vmatpush.msrb.mxu0 %v1783_v9  ;;  %479 = vmatpush.msrb.mxu1 %v1785_v10  ;;  %2766 = vst [vmem:[#allocation21_spill] sm:$0xff] %v1885_v46  ;;  %v110_v52 = vld [vmem:[#allocation5 + $0x20] sm:$0xff]  ;;  %v1908_v54 = vld [vmem:[#allocation10 + $0x68] sm:$0xff]  ;;  %v1911_v55 = vld [vmem:[#allocation10 + $0x70] sm:$0xff] }
  0x3f   :  { %499 = vmatpush.msrb.mxu2 %v1789_v11  ;;  %519 = vmatpush.msrb.mxu3 %v1791_v12  ;;  %2767 = vst [vmem:[#allocation22_spill] sm:$0xff] %v1887_v47  ;;  %v1906_v53 = vld [vmem:[#allocation10 + $0x60] sm:$0xff]  ;;  %v1913_v56 = vld [vmem:[#allocation10 + $0x78] sm:$0xff]  ;;  %v1917_v58 = vld [vmem:[#allocation10 + $0x48] sm:$0xff] }
  0x40   :  { %207 = vmatmul.f32.gmra.mxu0 %v107_v13  ;;  %248 = vmatmul.f32.gmra.mxu1 %v107_v13  ;;  %2768 = vst [vmem:[#allocation23_spill] sm:$0xff] %v1891_v48  ;;  %v1915_v57 = vld [vmem:[#allocation10 + $0x40] sm:$0xff]  ;;  %v1921_v59 = vld [vmem:[#allocation10 + $0x50] sm:$0xff]  ;;  %v1923_v60 = vld [vmem:[#allocation10 + $0x58] sm:$0xff] }
  0x41   :  { %289 = vmatmul.f32.gmra.mxu2 %v107_v13  ;;  %330 = vmatmul.f32.gmra.mxu3 %v107_v13  ;;  %2769 = vst [vmem:[#allocation24_spill] sm:$0xff] %v1893_v49  ;;  %v1927_v61 = vld [vmem:[#allocation10 + $0x20] sm:$0xff]  ;;  %v1929_v62 = vld [vmem:[#allocation10 + $0x28] sm:$0xff]  ;;  %v1933_v63 = vld [vmem:[#allocation10 + $0x30] sm:$0xff] }
  0x42   :  { %460 = vmatpush.msrb.mxu0 %v1798_v14  ;;  %480 = vmatpush.msrb.mxu1 %v1800_v15  ;;  %2770 = vst [vmem:[#allocation25_spill] sm:$0xff] %v1897_v50  ;;  %v1935_v0 = vld [vmem:[#allocation10 + $0x38] sm:$0xff]  ;;  %v111_v13 = vld [vmem:[#allocation5 + $0x28] sm:$0xff] }
  0x43   :  { %500 = vmatpush.msrb.mxu2 %v1803_v16  ;;  %520 = vmatpush.msrb.mxu3 %v1805_v17  ;;  %2771 = vst [vmem:[#allocation26_spill] sm:$0xff] %v1899_v51 }
  0x44   :  { %461 = vmatpush.msrb.mxu0 %v1807_v18  ;;  %481 = vmatpush.msrb.mxu1 %v1809_v19  ;;  %2772 = vst [vmem:[#allocation27_spill] sm:$0xff] %v1906_v53 }
  0x45   :  { %501 = vmatpush.msrb.mxu2 %v1813_v20  ;;  %521 = vmatpush.msrb.mxu3 %v1815_v21  ;;  %2773 = vst [vmem:[#allocation28_spill] sm:$0xff] %v1908_v54 }
  0x46   :  { %462 = vmatpush.msrb.mxu0 %v1819_v22  ;;  %482 = vmatpush.msrb.mxu1 %v1821_v23  ;;  %2774 = vst [vmem:[#allocation29_spill] sm:$0xff] %v1911_v55 }
  0x47   :  { %502 = vmatpush.msrb.mxu2 %v1825_v24  ;;  %522 = vmatpush.msrb.mxu3 %v1827_v25  ;;  %2775 = vst [vmem:[#allocation30_spill] sm:$0xff] %v1913_v56 }
  0x48   :  { %210 = vmatmul.f32.gmra.mxu0 %v108_v26  ;;  %251 = vmatmul.f32.gmra.mxu1 %v108_v26  ;;  %2776 = vst [vmem:[#allocation31_spill] sm:$0xff] %v1915_v57 }
  0x49   :  { %292 = vmatmul.f32.gmra.mxu2 %v108_v26  ;;  %333 = vmatmul.f32.gmra.mxu3 %v108_v26  ;;  %2777 = vst [vmem:[#allocation32_spill] sm:$0xff] %v1917_v58  ;;  %v1942_v26 = vld [vmem:[#allocation10] sm:$0xff] }
  0x4a   :  { %463 = vmatpush.msrb.mxu0 %v1834_v27  ;;  %483 = vmatpush.msrb.mxu1 %v1836_v28  ;;  %2778 = vst [vmem:[#allocation33_spill] sm:$0xff] %v1921_v59 }
  0x4b   :  { %503 = vmatpush.msrb.mxu2 %v1839_v29  ;;  %523 = vmatpush.msrb.mxu3 %v1841_v30  ;;  %2779 = vst [vmem:[#allocation34_spill] sm:$0xff] %v1923_v60 }
  0x4c   :  { %464 = vmatpush.msrb.mxu0 %v1843_v31  ;;  %484 = vmatpush.msrb.mxu1 %v1845_v32  ;;  %2780 = vst [vmem:[#allocation35_spill] sm:$0xff] %v1927_v61 }
  0x4d   :  { %504 = vmatpush.msrb.mxu2 %v1849_v33  ;;  %524 = vmatpush.msrb.mxu3 %v1851_v34  ;;  %2781 = vst [vmem:[#allocation36_spill] sm:$0xff] %v1929_v62 }
  0x4e   :  { %465 = vmatpush.msrb.mxu0 %v1855_v35  ;;  %485 = vmatpush.msrb.mxu1 %v1857_v36  ;;  %2782 = vst [vmem:[#allocation37_spill] sm:$0xff] %v1933_v63 }
  0x4f   :  { %505 = vmatpush.msrb.mxu2 %v1861_v37  ;;  %525 = vmatpush.msrb.mxu3 %v1863_v38  ;;  %2783 = vst [vmem:[#allocation38_spill] sm:$0xff] %v1935_v0 }
  0x50   :  { %213 = vmatmul.f32.gmra.mxu0 %v109_v39  ;;  %254 = vmatmul.f32.gmra.mxu1 %v109_v39  ;;  %2784 = vst [vmem:[#allocation39_spill] sm:$0xff] %v1942_v26 }
  0x51   :  { %295 = vmatmul.f32.gmra.mxu2 %v109_v39  ;;  %336 = vmatmul.f32.gmra.mxu3 %v109_v39  ;;  %v1944_v39 = vld [vmem:[#allocation10 + $0x8] sm:$0xff] }
  0x52   :  { %466 = vmatpush.msrb.mxu0 %v1870_v40  ;;  %486 = vmatpush.msrb.mxu1 %v1872_v41  ;;  %2785 = vst [vmem:[#allocation40_spill] sm:$0xff] %v1944_v39 }
  0x53   :  { %506 = vmatpush.msrb.mxu2 %v1875_v42  ;;  %526 = vmatpush.msrb.mxu3 %v1877_v43 }
  0x54   :  { %467 = vmatpush.msrb.mxu0 %v1879_v44  ;;  %487 = vmatpush.msrb.mxu1 %v1881_v45 }
  0x55   :  { %507 = vmatpush.msrb.mxu2 %v1885_v46  ;;  %527 = vmatpush.msrb.mxu3 %v1887_v47 }
  0x56   :  { %468 = vmatpush.msrb.mxu0 %v1891_v48  ;;  %488 = vmatpush.msrb.mxu1 %v1893_v49 }
  0x57   :  { %508 = vmatpush.msrb.mxu2 %v1897_v50  ;;  %528 = vmatpush.msrb.mxu3 %v1899_v51 }
  0x58   :  { %216 = vmatmul.f32.gmra.mxu0 %v110_v52  ;;  %257 = vmatmul.f32.gmra.mxu1 %v110_v52 }
  0x59   :  { %298 = vmatmul.f32.gmra.mxu2 %v110_v52  ;;  %339 = vmatmul.f32.gmra.mxu3 %v110_v52  ;;  %v1947_v52 = vld [vmem:[#allocation10 + $0x10] sm:$0xff] }
  0x5a   :  { %469 = vmatpush.msrb.mxu0 %v1906_v53  ;;  %489 = vmatpush.msrb.mxu1 %v1908_v54  ;;  %2786 = vst [vmem:[#allocation41_spill] sm:$0xff] %v1947_v52 }
  0x5b   :  { %509 = vmatpush.msrb.mxu2 %v1911_v55  ;;  %529 = vmatpush.msrb.mxu3 %v1913_v56 }
  0x5c   :  { %470 = vmatpush.msrb.mxu0 %v1915_v57  ;;  %490 = vmatpush.msrb.mxu1 %v1917_v58  ;;  %v1949_v58 = vld [vmem:[#allocation10 + $0x18] sm:$0xff] }
  0x5d   :  { %510 = vmatpush.msrb.mxu2 %v1921_v59  ;;  %530 = vmatpush.msrb.mxu3 %v1923_v60  ;;  %2787 = vst [vmem:[#allocation42_spill] sm:$0xff] %v1949_v58 }
  0x5e   :  { %471 = vmatpush.msrb.mxu0 %v1927_v61  ;;  %491 = vmatpush.msrb.mxu1 %v1929_v62 }
  0x5f   :  { %511 = vmatpush.msrb.mxu2 %v1933_v63  ;;  %531 = vmatpush.msrb.mxu3 %v1935_v0  ;;  %v112_v0 = vld [vmem:[#allocation5 + $0x30] sm:$0xff] }
  0x60   :  { %219 = vmatmul.f32.gmra.mxu0 %v111_v13  ;;  %260 = vmatmul.f32.gmra.mxu1 %v111_v13 }
  0x61   :  { %301 = vmatmul.f32.gmra.mxu2 %v111_v13  ;;  %342 = vmatmul.f32.gmra.mxu3 %v111_v13  ;;  %v113_v13 = vld [vmem:[#allocation5 + $0x38] sm:$0xff] }
  0x62   :  { %472 = vmatpush.msrb.mxu0 %v1942_v26  ;;  %492 = vmatpush.msrb.mxu1 %v1944_v39 }
  0x63   :  { %512 = vmatpush.msrb.mxu2 %v1947_v52  ;;  %532 = vmatpush.msrb.mxu3 %v1949_v58 }
  0x64   :  { %566 = vmatpush.msra.mxu0 %v1763_v1  ;;  %586 = vmatpush.msra.mxu1 %v1765_v2 }
  0x65   :  { %606 = vmatpush.msra.mxu2 %v1767_v3  ;;  %626 = vmatpush.msra.mxu3 %v1769_v4 }
  0x66   :  { %567 = vmatpush.msra.mxu0 %v1771_v5  ;;  %587 = vmatpush.msra.mxu1 %v1773_v6 }
  0x67   :  { %607 = vmatpush.msra.mxu2 %v1777_v7  ;;  %627 = vmatpush.msra.mxu3 %v1779_v8 }
  0x68   :  { %222 = vmatmul.f32.gmra.mxu0 %v112_v0  ;;  %263 = vmatmul.f32.gmra.mxu1 %v112_v0 }
  0x69   :  { %304 = vmatmul.f32.gmra.mxu2 %v112_v0  ;;  %345 = vmatmul.f32.gmra.mxu3 %v112_v0  ;;  %v1711_v0 = vmov 0.0  }
  0x6a   :  { %568 = vmatpush.msra.mxu0 %v1783_v9  ;;  %588 = vmatpush.msra.mxu1 %v1785_v10 }
  0x6b   :  { %608 = vmatpush.msra.mxu2 %v1789_v11  ;;  %628 = vmatpush.msra.mxu3 %v1791_v12 }
  0x6c   :  { %569 = vmatpush.msra.mxu0 %v1798_v14  ;;  %589 = vmatpush.msra.mxu1 %v1800_v15 }
  0x6d   :  { %609 = vmatpush.msra.mxu2 %v1803_v16  ;;  %629 = vmatpush.msra.mxu3 %v1805_v17 }
  0x6e   :  { %570 = vmatpush.msra.mxu0 %v1807_v18  ;;  %590 = vmatpush.msra.mxu1 %v1809_v19 }
  0x6f   :  { %610 = vmatpush.msra.mxu2 %v1813_v20  ;;  %630 = vmatpush.msra.mxu3 %v1815_v21 }
  0x70   :  { %225 = vmatmul.f32.gmra.mxu0 %v113_v13  ;;  %266 = vmatmul.f32.gmra.mxu1 %v113_v13 }
  0x71   :  { %307 = vmatmul.f32.gmra.mxu2 %v113_v13  ;;  %348 = vmatmul.f32.gmra.mxu3 %v113_v13  ;;  %v2788_v13 = vld [vmem:[#allocation32_spill] sm:$0xff] }
  0x72   :  { %571 = vmatpush.msra.mxu0 %v1819_v22  ;;  %591 = vmatpush.msra.mxu1 %v1821_v23 }
  0x73   :  { %611 = vmatpush.msra.mxu2 %v1825_v24  ;;  %631 = vmatpush.msra.mxu3 %v1827_v25 }
  0x74   :  { %572 = vmatpush.msra.mxu0 %v1834_v27  ;;  %592 = vmatpush.msra.mxu1 %v1836_v28 }
  0x75   :  { %612 = vmatpush.msra.mxu2 %v1839_v29  ;;  %632 = vmatpush.msra.mxu3 %v1841_v30 }
  0x76   :  { %573 = vmatpush.msra.mxu0 %v1843_v31  ;;  %593 = vmatpush.msra.mxu1 %v1845_v32 }
  0x77   :  { %613 = vmatpush.msra.mxu2 %v1849_v33  ;;  %633 = vmatpush.msra.mxu3 %v1851_v34 }
  0x78   :  { %473 = vmatmul.f32.vlgmr.msrb.gmra.mxu0 %v1711_v0  ;;  %493 = vmatmul.f32.vlgmr.msrb.gmra.mxu1 %v1711_v0 }
  0x79   :  { %513 = vmatmul.f32.vlgmr.msrb.gmra.mxu2 %v1711_v0  ;;  %533 = vmatmul.f32.vlgmr.msrb.gmra.mxu3 %v1711_v0  ;;  %v2789_v0 = vld [vmem:[#allocation38_spill] sm:$0xff] }
  0x7a   :  { %574 = vmatpush.msra.mxu0 %v1855_v35  ;;  %594 = vmatpush.msra.mxu1 %v1857_v36 }
  0x7b   :  { %614 = vmatpush.msra.mxu2 %v1861_v37  ;;  %634 = vmatpush.msra.mxu3 %v1863_v38 }
  0x7c   :  { %575 = vmatpush.msra.mxu0 %v1870_v40  ;;  %595 = vmatpush.msra.mxu1 %v1872_v41 }
  0x7d   :  { %615 = vmatpush.msra.mxu2 %v1875_v42  ;;  %635 = vmatpush.msra.mxu3 %v1877_v43 }
  0x7e   :  { %576 = vmatpush.msra.mxu0 %v1879_v44  ;;  %596 = vmatpush.msra.mxu1 %v1881_v45 }
  0x7f   :  { %616 = vmatpush.msra.mxu2 %v1885_v46  ;;  %636 = vmatpush.msra.mxu3 %v1887_v47 }
  0x80   :  { %577 = vmatpush.msra.mxu0 %v1891_v48  ;;  %597 = vmatpush.msra.mxu1 %v1893_v49 }
  0x81   :  { %617 = vmatpush.msra.mxu2 %v1897_v50  ;;  %637 = vmatpush.msra.mxu3 %v1899_v51 }
  0x82   :  { %578 = vmatpush.msra.mxu0 %v1906_v53  ;;  %598 = vmatpush.msra.mxu1 %v1908_v54 }
  0x83   :  { %618 = vmatpush.msra.mxu2 %v1911_v55  ;;  %638 = vmatpush.msra.mxu3 %v1913_v56 }
  0x84   :  { %579 = vmatpush.msra.mxu0 %v1915_v57  ;;  %599 = vmatpush.msra.mxu1 %v2788_v13 }
  0x85   :  { %619 = vmatpush.msra.mxu2 %v1921_v59  ;;  %639 = vmatpush.msra.mxu3 %v1923_v60 }
  0x86   :  { %580 = vmatpush.msra.mxu0 %v1927_v61  ;;  %600 = vmatpush.msra.mxu1 %v1929_v62 }
  0x87   :  { %620 = vmatpush.msra.mxu2 %v1933_v63  ;;  %640 = vmatpush.msra.mxu3 %v2789_v0 }
  0x88   :  { %581 = vmatpush.msra.mxu0 %v1942_v26  ;;  %601 = vmatpush.msra.mxu1 %v1944_v39 }
  0x89   :  { %621 = vmatpush.msra.mxu2 %v1947_v52  ;;  %641 = vmatpush.msra.mxu3 %v1949_v58 }
  0x8a   :  { %675 = vmatpush.msrb.mxu0 %v1763_v1  ;;  %695 = vmatpush.msrb.mxu1 %v1765_v2 }
  0x8b   :  { %715 = vmatpush.msrb.mxu2 %v1767_v3  ;;  %735 = vmatpush.msrb.mxu3 %v1769_v4 }
  0x8c   :  { %676 = vmatpush.msrb.mxu0 %v1771_v5  ;;  %696 = vmatpush.msrb.mxu1 %v1773_v6 }
  0x8d   :  { %716 = vmatpush.msrb.mxu2 %v1777_v7  ;;  %736 = vmatpush.msrb.mxu3 %v1779_v8 }
  0x8e   :  { %677 = vmatpush.msrb.mxu0 %v1783_v9  ;;  %697 = vmatpush.msrb.mxu1 %v1785_v10 }
  0x8f   :  { %717 = vmatpush.msrb.mxu2 %v1789_v11  ;;  %737 = vmatpush.msrb.mxu3 %v1791_v12 }
  0x90   :  { %678 = vmatpush.msrb.mxu0 %v1798_v14  ;;  %698 = vmatpush.msrb.mxu1 %v1800_v15 }
  0x91   :  { %718 = vmatpush.msrb.mxu2 %v1803_v16  ;;  %738 = vmatpush.msrb.mxu3 %v1805_v17 }
  0x92   :  { %679 = vmatpush.msrb.mxu0 %v1807_v18  ;;  %699 = vmatpush.msrb.mxu1 %v1809_v19 }
  0x93   :  { %719 = vmatpush.msrb.mxu2 %v1813_v20  ;;  %739 = vmatpush.msrb.mxu3 %v1815_v21 }
  0x94   :  { %680 = vmatpush.msrb.mxu0 %v1819_v22  ;;  %700 = vmatpush.msrb.mxu1 %v1821_v23 }
  0x95   :  { %720 = vmatpush.msrb.mxu2 %v1825_v24  ;;  %740 = vmatpush.msrb.mxu3 %v1827_v25 }
  0x96   :  { %681 = vmatpush.msrb.mxu0 %v1834_v27  ;;  %701 = vmatpush.msrb.mxu1 %v1836_v28 }
  0x97   :  { %721 = vmatpush.msrb.mxu2 %v1839_v29  ;;  %741 = vmatpush.msrb.mxu3 %v1841_v30 }
  0x98   :  { %682 = vmatpush.msrb.mxu0 %v1843_v31  ;;  %702 = vmatpush.msrb.mxu1 %v1845_v32 }
  0x99   :  { %722 = vmatpush.msrb.mxu2 %v1849_v33  ;;  %742 = vmatpush.msrb.mxu3 %v1851_v34 }
  0x9a   :  { %683 = vmatpush.msrb.mxu0 %v1855_v35  ;;  %703 = vmatpush.msrb.mxu1 %v1857_v36 }
  0x9b   :  { %723 = vmatpush.msrb.mxu2 %v1861_v37  ;;  %743 = vmatpush.msrb.mxu3 %v1863_v38 }
  0x9c   :  { %684 = vmatpush.msrb.mxu0 %v1870_v40  ;;  %704 = vmatpush.msrb.mxu1 %v1872_v41 }
  0x9d   :  { %724 = vmatpush.msrb.mxu2 %v1875_v42  ;;  %744 = vmatpush.msrb.mxu3 %v1877_v43 }
  0x9e   :  { %685 = vmatpush.msrb.mxu0 %v1879_v44  ;;  %705 = vmatpush.msrb.mxu1 %v1881_v45 }
  0x9f   :  { %725 = vmatpush.msrb.mxu2 %v1885_v46  ;;  %745 = vmatpush.msrb.mxu3 %v1887_v47 }
  0xa0   :  { %686 = vmatpush.msrb.mxu0 %v1891_v48  ;;  %706 = vmatpush.msrb.mxu1 %v1893_v49 }
  0xa1   :  { %726 = vmatpush.msrb.mxu2 %v1897_v50  ;;  %746 = vmatpush.msrb.mxu3 %v1899_v51 }
  0xa2   :  { %687 = vmatpush.msrb.mxu0 %v1906_v53  ;;  %707 = vmatpush.msrb.mxu1 %v1908_v54 }
  0xa3   :  { %727 = vmatpush.msrb.mxu2 %v1911_v55  ;;  %747 = vmatpush.msrb.mxu3 %v1913_v56 }
  0xa4   :  { %688 = vmatpush.msrb.mxu0 %v1915_v57  ;;  %708 = vmatpush.msrb.mxu1 %v2788_v13  ;;  %v178_v57 = vld [vmem:[#allocation11] sm:$0xf] }
  0xa5   :  { %728 = vmatpush.msrb.mxu2 %v1921_v59  ;;  %748 = vmatpush.msrb.mxu3 %v1923_v60  ;;  %v180_v60 = vperm.slane %v178_v57, 0  ;;  %v181_v56 = vperm.slane %v178_v57, 1 }
  0xa6   :  { %689 = vmatpush.msrb.mxu0 %v1927_v61  ;;  %709 = vmatpush.msrb.mxu1 %v1929_v62 }
  0xa7   :  { %729 = vmatpush.msrb.mxu2 %v1933_v63  ;;  %749 = vmatpush.msrb.mxu3 %v2789_v0 }
  0xa8   :  { %690 = vmatpush.msrb.mxu0 %v1942_v26  ;;  %710 = vmatpush.msrb.mxu1 %v1944_v39  ;;  %v2091_v39 = vperm.slane %v178_v57, 2 }
  0xa9   :  { %730 = vmatpush.msrb.mxu2 %v1947_v52  ;;  %750 = vmatpush.msrb.mxu3 %v1949_v58  ;;  %v2093_v52 = vperm.slane %v178_v57, 3 }
  0xb5   :  { %v205_v13 = vpop.f32.mrf.mxu0  ;;  %v246_v59 = vpop.f32.mrf.mxu1 }
  0xbc   :  { %v2083_v61 = vpop.f32.mrf.mxu2  ;;  %v2085_v62 = vpop.f32.mrf.mxu3 }
  0xbd   :  { %v208_v63 = vpop.f32.mrf.mxu0  ;;  %v249_v55 = vpop.f32.mrf.mxu1 }
  0xbe   :  { %v2087_v0 = vadd.f32 %v208_v63, %v180_v60  ;;  %v2089_v26 = vadd.f32 %v249_v55, %v181_v56 }
  0xc0   :  { %2790 = vst [vmem:[#allocation43_spill] sm:$0xff] %v2087_v0 }
  0xc1   :  { %2791 = vst [vmem:[#allocation44_spill] sm:$0xff] %v2089_v26 }
  0xc4   :  { %v290_v58 = vpop.f32.mrf.mxu2  ;;  %v331_v54 = vpop.f32.mrf.mxu3 }
  0xc5   :  { %v2096_v53 = vadd.f32 %v290_v58, %v2091_v39  ;;  %v2099_v51 = vadd.f32 %v331_v54, %v2093_v52  ;;  %v211_v50 = vpop.f32.mrf.mxu0  ;;  %v252_v49 = vpop.f32.mrf.mxu1 }
  0xc6   :  { %v2101_v48 = vadd.f32 %v211_v50, %v180_v60  ;;  %v2103_v63 = vadd.f32 %v252_v49, %v181_v56 }
  0xc7   :  { %2792 = vst [vmem:[#allocation45_spill] sm:$0xff] %v2096_v53 }
  0xc8   :  { %2793 = vst [vmem:[#allocation46_spill] sm:$0xff] %v2099_v51 }
  0xc9   :  { %2794 = vst [vmem:[#allocation47_spill] sm:$0xff] %v2101_v48 }
  0xca   :  { %2795 = vst [vmem:[#allocation48_spill] sm:$0xff] %v2103_v63 }
  0xcc   :  { %v293_v55 = vpop.f32.mrf.mxu2  ;;  %v334_v26 = vpop.f32.mrf.mxu3 }
  0xcd   :  { %v2106_v0 = vadd.f32 %v293_v55, %v2091_v39  ;;  %v2109_v57 = vadd.f32 %v334_v26, %v2093_v52  ;;  %v214_v47 = vpop.f32.mrf.mxu0  ;;  %v255_v58 = vpop.f32.mrf.mxu1 }
  0xce   :  { %v2111_v53 = vadd.f32 %v214_v47, %v180_v60  ;;  %v2113_v54 = vadd.f32 %v255_v58, %v181_v56 }
  0xcf   :  { %2796 = vst [vmem:[#allocation49_spill] sm:$0xff] %v2106_v0 }
  0xd0   :  { %2797 = vst [vmem:[#allocation50_spill] sm:$0xff] %v2109_v57 }
  0xd1   :  { %2798 = vst [vmem:[#allocation51_spill] sm:$0xff] %v2111_v53 }
  0xd2   :  { %2799 = vst [vmem:[#allocation52_spill] sm:$0xff] %v2113_v54 }
  0xd4   :  { %v296_v51 = vpop.f32.mrf.mxu2  ;;  %v337_v46 = vpop.f32.mrf.mxu3 }
  0xd5   :  { %v2116_v50 = vadd.f32 %v296_v51, %v2091_v39  ;;  %v2119_v49 = vadd.f32 %v337_v46, %v2093_v52  ;;  %v217_v63 = vpop.f32.mrf.mxu0  ;;  %v258_v55 = vpop.f32.mrf.mxu1 }
  0xd6   :  { %v2121_v0 = vadd.f32 %v217_v63, %v180_v60  ;;  %v2123_v26 = vadd.f32 %v258_v55, %v181_v56 }
  0xd7   :  { %2800 = vst [vmem:[#allocation53_spill] sm:$0xff] %v2116_v50 }
  0xd8   :  { %2801 = vst [vmem:[#allocation54_spill] sm:$0xff] %v2119_v49 }
  0xd9   :  { %2802 = vst [vmem:[#allocation55_spill] sm:$0xff] %v2121_v0 }
  0xda   :  { %2803 = vst [vmem:[#allocation56_spill] sm:$0xff] %v2123_v26 }
  0xdc   :  { %v299_v57 = vpop.f32.mrf.mxu2  ;;  %v340_v48 = vpop.f32.mrf.mxu3 }
  0xdd   :  { %v2126_v47 = vadd.f32 %v299_v57, %v2091_v39  ;;  %v2129_v58 = vadd.f32 %v340_v48, %v2093_v52  ;;  %v220_v54 = vpop.f32.mrf.mxu0  ;;  %v261_v51 = vpop.f32.mrf.mxu1 }
  0xde   :  { %v2131_v50 = vadd.f32 %v220_v54, %v180_v60  ;;  %v2133_v46 = vadd.f32 %v261_v51, %v181_v56 }
  0xdf   :  { %2804 = vst [vmem:[#allocation57_spill] sm:$0xff] %v2126_v47 }
  0xe0   :  { %2805 = vst [vmem:[#allocation58_spill] sm:$0xff] %v2129_v58 }
  0xe1   :  { %2806 = vst [vmem:[#allocation59_spill] sm:$0xff] %v2131_v50  ;;  %v247_v50 = vadd.f32 %v246_v59, %v181_v56 }
  0xe2   :  { %2807 = vst [vmem:[#allocation60_spill] sm:$0xff] %v2133_v46 }
  0xe4   :  { %v302_v49 = vpop.f32.mrf.mxu2  ;;  %v343_v53 = vpop.f32.mrf.mxu3 }
  0xe5   :  { %v2136_v63 = vadd.f32 %v302_v49, %v2091_v39  ;;  %v2139_v55 = vadd.f32 %v343_v53, %v2093_v52  ;;  %v223_v26 = vpop.f32.mrf.mxu0  ;;  %v264_v57 = vpop.f32.mrf.mxu1 }
  0xe6   :  { %v2141_v47 = vadd.f32 %v223_v26, %v180_v60  ;;  %v2143_v48 = vadd.f32 %v264_v57, %v181_v56 }
  0xe7   :  { %2808 = vst [vmem:[#allocation61_spill] sm:$0xff] %v2136_v63 }
  0xe8   :  { %2809 = vst [vmem:[#allocation62_spill] sm:$0xff] %v2139_v55  ;;  %v206_v55 = vadd.f32 %v205_v13, %v180_v60 }
  0xe9   :  { %2810 = vst [vmem:[#allocation63_spill] sm:$0xff] %v2141_v47 }
  0xea   :  { %2811 = vst [vmem:[#allocation64_spill] sm:$0xff] %v2143_v48 }
  0xec   :  { %v305_v58 = vpop.f32.mrf.mxu2  ;;  %v346_v0 = vpop.f32.mrf.mxu3 }
  0xed   :  { %v2146_v54 = vadd.f32 %v305_v58, %v2091_v39  ;;  %v2149_v51 = vadd.f32 %v346_v0, %v2093_v52  ;;  %v226_v46 = vpop.f32.mrf.mxu0  ;;  %v267_v49 = vpop.f32.mrf.mxu1 }
  0xee   :  { %v2151_v63 = vadd.f32 %v226_v46, %v180_v60  ;;  %v2153_v53 = vadd.f32 %v267_v49, %v181_v56  ;;  %v288_v46 = vadd.f32 %v2083_v61, %v2091_v39  ;;  %v329_v56 = vadd.f32 %v2085_v62, %v2093_v52 }
  0xef   :  { %2812 = vst [vmem:[#allocation65_spill] sm:$0xff] %v2146_v54 }
  0xf0   :  { %2813 = vst [vmem:[#allocation66_spill] sm:$0xff] %v2149_v51 }
  0xf1   :  { %2814 = vst [vmem:[#allocation67_spill] sm:$0xff] %v2151_v63  ;;  %v2840_v63 = vld [vmem:[#allocation41_spill] sm:$0xff] }
  0xf2   :  { %2815 = vst [vmem:[#allocation68_spill] sm:$0xff] %v2153_v53  ;;  %v2839_v53 = vld [vmem:[#allocation40_spill] sm:$0xff] }
  0xf4   :  { %v308_v26 = vpop.f32.mrf.mxu2  ;;  %v349_v47 = vpop.f32.mrf.mxu3 }
  0xf5   :  { %v2156_v57 = vadd.f32 %v308_v26, %v2091_v39  ;;  %v2159_v48 = vadd.f32 %v349_v47, %v2093_v52  ;;  %v474_v58 = vpop.f32.mrf.mxu0  ;;  %v494_v54 = vpop.f32.mrf.mxu1 }
  0xf6   :  { %v537_v0 = vadd.f32 %v474_v58, %v206_v55  ;;  %v538_v51 = vadd.f32 %v494_v54, %v247_v50 }
  0xf7   :  { %2816 = vst [vmem:[#allocation69_spill] sm:$0xff] %v2156_v57  ;;  %v2838_v57 = vld [vmem:[#allocation39_spill] sm:$0xff] }
  0xf8   :  { %2817 = vst [vmem:[#allocation70_spill] sm:$0xff] %v2159_v48  ;;  %v541_v45 = vmul.f32 0.5, %v537_v0  ;;  %v545_v44 = vmul.f32 0.5, %v538_v51 }
  0xfa   :  { %1406 = vtanh.f32 %v541_v45 }
  0xfb   :  { %1408 = vtanh.f32 %v545_v44 }
  0xfc   :  { %v514_v59 = vpop.f32.mrf.mxu2  ;;  %v534_v60 = vpop.f32.mrf.mxu3 }
  0xfd   :  { %v539_v13 = vadd.f32 %v514_v59, %v288_v46  ;;  %v540_v49 = vadd.f32 %v534_v60, %v329_v56  ;;  %v2819_v56 = vld [vmem:[#allocation20_spill] sm:$0xff]  ;;  %v2820_v59 = vld [vmem:[#allocation21_spill] sm:$0xff]  ;;  %v2821_v60 = vld [vmem:[#allocation22_spill] sm:$0xff] }
  0xff   :  { %1410 = vtanh.f32 %v539_v13  ;;  %v550_v47 = vmul.f32 0.5, %v540_v49  ;;  %v2822_v13 = vld [vmem:[#allocation23_spill] sm:$0xff]  ;;  %v2823_v49 = vld [vmem:[#allocation24_spill] sm:$0xff] }
 0x100   :  { %v1407_v26 = vpop.eup %1406 }
 0x101   :  { %v1409_v48 = vpop.eup %1408  ;;  %v543_v55 = vmul.f32 0.5, %v1407_v26  ;;  %1412 = vtanh.f32 %v550_v47  ;;  %v2824_v47 = vld [vmem:[#allocation25_spill] sm:$0xff]  ;;  %v2825_v26 = vld [vmem:[#allocation26_spill] sm:$0xff] }
 0x102   :  { %v547_v50 = vmul.f32 0.5, %v1409_v48  ;;  %v2818_v48 = vld [vmem:[#allocation19_spill] sm:$0xff] }
 0x103   :  { %v544_v54 = vadd.f32 0.5, %v543_v55  ;;  %v2826_v55 = vld [vmem:[#allocation27_spill] sm:$0xff] }
 0x104   :  { %v548_v45 = vadd.f32 0.5, %v547_v50  ;;  %v2827_v50 = vld [vmem:[#allocation28_spill] sm:$0xff] }
 0x105   :  { %v1411_v51 = vpop.eup %1410 }
 0x106   :  { %v554_v58 = vmul.f32 0.0, %v548_v45  ;;  %v555_v61 = vmul.f32 %v1411_v51, %v544_v54  ;;  %v2828_v54 = vld [vmem:[#allocation29_spill] sm:$0xff]  ;;  %v2829_v45 = vld [vmem:[#allocation30_spill] sm:$0xff]  ;;  %v2830_v51 = vld [vmem:[#allocation31_spill] sm:$0xff] }
 0x107   :  { %v1413_v39 = vpop.eup %1412 }
 0x108   :  { %v2165_v0 = vadd.f32 %v555_v61, %v554_v58  ;;  %v552_v44 = vmul.f32 0.5, %v1413_v39  ;;  %v2831_v58 = vld [vmem:[#allocation32_spill] sm:$0xff]  ;;  %v2832_v61 = vld [vmem:[#allocation33_spill] sm:$0xff]  ;;  %v2833_v39 = vld [vmem:[#allocation34_spill] sm:$0xff] }
 0x10a   :  { %1414 = vtanh.f32 %v2165_v0  ;;  %v553_v62 = vadd.f32 0.5, %v552_v44  ;;  %v2834_v44 = vld [vmem:[#allocation35_spill] sm:$0xff] }
 0x110   :  { %v1415_v52 = vpop.eup %1414 }
 0x111   :  { %v558_v46 = vmul.f32 %v1415_v52, %v553_v62  ;;  %v2835_v62 = vld [vmem:[#allocation36_spill] sm:$0xff]  ;;  %v2836_v52 = vld [vmem:[#allocation37_spill] sm:$0xff] }
 0x113   :  { %582 = vmatmul.f32.vlgmr.msra.gmra.mxu0 %v558_v46  ;;  %602 = vmatmul.f32.vlgmr.msra.gmra.mxu1 %v558_v46 }
 0x114   :  { %622 = vmatmul.f32.vlgmr.msra.gmra.mxu2 %v558_v46  ;;  %642 = vmatmul.f32.vlgmr.msra.gmra.mxu3 %v558_v46  ;;  %v2837_v46 = vld [vmem:[#allocation38_spill] sm:$0xff] }
 0x115   :  { %784 = vmatpush.msra.mxu0 %v1763_v1  ;;  %804 = vmatpush.msra.mxu1 %v1765_v2 }
 0x116   :  { %824 = vmatpush.msra.mxu2 %v1767_v3  ;;  %844 = vmatpush.msra.mxu3 %v1769_v4 }
 0x117   :  { %785 = vmatpush.msra.mxu0 %v1771_v5  ;;  %805 = vmatpush.msra.mxu1 %v1773_v6 }
 0x118   :  { %825 = vmatpush.msra.mxu2 %v1777_v7  ;;  %845 = vmatpush.msra.mxu3 %v1779_v8 }
 0x119   :  { %786 = vmatpush.msra.mxu0 %v1783_v9  ;;  %806 = vmatpush.msra.mxu1 %v1785_v10 }
 0x11a   :  { %826 = vmatpush.msra.mxu2 %v1789_v11  ;;  %846 = vmatpush.msra.mxu3 %v1791_v12 }
 0x11b   :  { %787 = vmatpush.msra.mxu0 %v1798_v14  ;;  %807 = vmatpush.msra.mxu1 %v1800_v15 }
 0x11c   :  { %827 = vmatpush.msra.mxu2 %v1803_v16  ;;  %847 = vmatpush.msra.mxu3 %v1805_v17 }
 0x11d   :  { %788 = vmatpush.msra.mxu0 %v1807_v18  ;;  %808 = vmatpush.msra.mxu1 %v1809_v19 }
 0x11e   :  { %828 = vmatpush.msra.mxu2 %v1813_v20  ;;  %848 = vmatpush.msra.mxu3 %v1815_v21 }
 0x11f   :  { %789 = vmatpush.msra.mxu0 %v1819_v22  ;;  %809 = vmatpush.msra.mxu1 %v1821_v23 }
 0x120   :  { %829 = vmatpush.msra.mxu2 %v1825_v24  ;;  %849 = vmatpush.msra.mxu3 %v1827_v25 }
 0x121   :  { %790 = vmatpush.msra.mxu0 %v1834_v27  ;;  %810 = vmatpush.msra.mxu1 %v1836_v28 }
 0x122   :  { %830 = vmatpush.msra.mxu2 %v1839_v29  ;;  %850 = vmatpush.msra.mxu3 %v1841_v30 }
 0x123   :  { %791 = vmatpush.msra.mxu0 %v1843_v31  ;;  %811 = vmatpush.msra.mxu1 %v1845_v32 }
 0x124   :  { %831 = vmatpush.msra.mxu2 %v1849_v33  ;;  %851 = vmatpush.msra.mxu3 %v1851_v34 }
 0x125   :  { %792 = vmatpush.msra.mxu0 %v1855_v35  ;;  %812 = vmatpush.msra.mxu1 %v1857_v36 }
 0x126   :  { %832 = vmatpush.msra.mxu2 %v1861_v37  ;;  %852 = vmatpush.msra.mxu3 %v1863_v38 }
 0x127   :  { %793 = vmatpush.msra.mxu0 %v1870_v40  ;;  %813 = vmatpush.msra.mxu1 %v1872_v41 }
 0x128   :  { %833 = vmatpush.msra.mxu2 %v1875_v42  ;;  %853 = vmatpush.msra.mxu3 %v1877_v43 }
 0x129   :  { %794 = vmatpush.msra.mxu0 %v2818_v48  ;;  %814 = vmatpush.msra.mxu1 %v2819_v56 }
 0x12a   :  { %834 = vmatpush.msra.mxu2 %v2820_v59  ;;  %854 = vmatpush.msra.mxu3 %v2821_v60 }
 0x12b   :  { %795 = vmatpush.msra.mxu0 %v2822_v13  ;;  %815 = vmatpush.msra.mxu1 %v2823_v49 }
 0x12c   :  { %835 = vmatpush.msra.mxu2 %v2824_v47  ;;  %855 = vmatpush.msra.mxu3 %v2825_v26  ;;  %v2845_v26 = vld [vmem:[#allocation46_spill] sm:$0xff] }
 0x12d   :  { %796 = vmatpush.msra.mxu0 %v2826_v55  ;;  %816 = vmatpush.msra.mxu1 %v2827_v50  ;;  %v2844_v55 = vld [vmem:[#allocation45_spill] sm:$0xff] }
 0x12e   :  { %836 = vmatpush.msra.mxu2 %v2828_v54  ;;  %856 = vmatpush.msra.mxu3 %v2829_v45  ;;  %v2842_v45 = vld [vmem:[#allocation43_spill] sm:$0xff]  ;;  %v2843_v54 = vld [vmem:[#allocation44_spill] sm:$0xff] }
 0x12f   :  { %797 = vmatpush.msra.mxu0 %v2830_v51  ;;  %817 = vmatpush.msra.mxu1 %v2831_v58  ;;  %v2841_v51 = vld [vmem:[#allocation42_spill] sm:$0xff] }
 0x130   :  { %837 = vmatpush.msra.mxu2 %v2832_v61  ;;  %857 = vmatpush.msra.mxu3 %v2833_v39 }
 0x131   :  { %798 = vmatpush.msra.mxu0 %v2834_v44  ;;  %818 = vmatpush.msra.mxu1 %v2835_v62 }
 0x132   :  { %838 = vmatpush.msra.mxu2 %v2836_v52  ;;  %858 = vmatpush.msra.mxu3 %v2837_v46 }
 0x133   :  { %799 = vmatpush.msra.mxu0 %v2838_v57  ;;  %819 = vmatpush.msra.mxu1 %v2839_v53 }
 0x134   :  { %839 = vmatpush.msra.mxu2 %v2840_v63  ;;  %859 = vmatpush.msra.mxu3 %v2841_v51 }
 0x190   :  { %v583_v58 = vpop.f32.mrf.mxu0  ;;  %v603_v61 = vpop.f32.mrf.mxu1 }
 0x191   :  { %v646_v39 = vadd.f32 %v583_v58, %v2842_v45  ;;  %v647_v44 = vadd.f32 %v603_v61, %v2843_v54 }
 0x193   :  { %v650_v50 = vmul.f32 0.5, %v646_v39  ;;  %v654_v62 = vmul.f32 0.5, %v647_v44 }
 0x195   :  { %1416 = vtanh.f32 %v650_v50 }
 0x196   :  { %1418 = vtanh.f32 %v654_v62  ;;  %v2312_v62 = vld [vmem:[#allocation10 + $0x1e0] sm:$0xff] }
 0x197   :  { %v623_v52 = vpop.f32.mrf.mxu2  ;;  %v643_v46 = vpop.f32.mrf.mxu3 }
 0x198   :  { %v648_v57 = vadd.f32 %v623_v52, %v2844_v55  ;;  %v649_v53 = vadd.f32 %v643_v46, %v2845_v26  ;;  %v2315_v52 = vld [vmem:[#allocation10 + $0x1e8] sm:$0xff]  ;;  %v2318_v46 = vld [vmem:[#allocation10 + $0x1f0] sm:$0xff] }
 0x19a   :  { %1420 = vtanh.f32 %v648_v57  ;;  %v659_v63 = vmul.f32 0.5, %v649_v53 }
 0x19b   :  { %v1417_v47 = vpop.eup %1416 }
 0x19c   :  { %v1419_v51 = vpop.eup %1418  ;;  %v652_v49 = vmul.f32 0.5, %v1417_v47  ;;  %1422 = vtanh.f32 %v659_v63 }
 0x19d   :  { %v656_v13 = vmul.f32 0.5, %v1419_v51 }
 0x19e   :  { %v653_v45 = vadd.f32 0.5, %v652_v49 }
 0x19f   :  { %v657_v58 = vadd.f32 0.5, %v656_v13 }
 0x1a0   :  { %v1421_v54 = vpop.eup %1420 }
 0x1a1   :  { %v663_v61 = vmul.f32 %v657_v58, %v2165_v0  ;;  %v664_v50 = vmul.f32 %v1421_v54, %v653_v45  ;;  %v2321_v45 = vld [vmem:[#allocation10 + $0x1f8] sm:$0xff]  ;;  %v2324_v58 = vld [vmem:[#allocation10 + $0x1c0] sm:$0xff]  ;;  %v2327_v54 = vld [vmem:[#allocation10 + $0x1c8] sm:$0xff] }
 0x1a2   :  { %v1423_v39 = vpop.eup %1422 }
 0x1a3   :  { %v2237_v44 = vadd.f32 %v664_v50, %v663_v61  ;;  %v661_v55 = vmul.f32 0.5, %v1423_v39  ;;  %v2330_v61 = vld [vmem:[#allocation10 + $0x1d0] sm:$0xff]  ;;  %v2333_v50 = vld [vmem:[#allocation10 + $0x1d8] sm:$0xff]  ;;  %v2336_v39 = vld [vmem:[#allocation10 + $0x1a0] sm:$0xff] }
 0x1a5   :  { %1424 = vtanh.f32 %v2237_v44  ;;  %v662_v26 = vadd.f32 0.5, %v661_v55  ;;  %v2342_v55 = vld [vmem:[#allocation10 + $0x1b0] sm:$0xff] }
 0x1ab   :  { %v1425_v57 = vpop.eup %1424 }
 0x1ac   :  { %v667_v53 = vmul.f32 %v1425_v57, %v662_v26  ;;  %v2345_v26 = vld [vmem:[#allocation10 + $0x1b8] sm:$0xff]  ;;  %v2348_v57 = vld [vmem:[#allocation10 + $0x180] sm:$0xff] }
 0x1ae   :  { %691 = vmatmul.f32.vlgmr.msrb.gmra.mxu0 %v667_v53  ;;  %711 = vmatmul.f32.vlgmr.msrb.gmra.mxu1 %v667_v53 }
 0x1af   :  { %731 = vmatmul.f32.vlgmr.msrb.gmra.mxu2 %v667_v53  ;;  %751 = vmatmul.f32.vlgmr.msrb.gmra.mxu3 %v667_v53  ;;  %v2351_v53 = vld [vmem:[#allocation10 + $0x188] sm:$0xff] }
 0x1b0   :  { %893 = vmatpush.msrb.mxu0 %v1763_v1  ;;  %913 = vmatpush.msrb.mxu1 %v1765_v2  ;;  %v2846_v1 = vld [vmem:[#allocation23_spill] sm:$0xff]  ;;  %v2847_v2 = vld [vmem:[#allocation24_spill] sm:$0xff] }
 0x1b1   :  { %933 = vmatpush.msrb.mxu2 %v1767_v3  ;;  %953 = vmatpush.msrb.mxu3 %v1769_v4  ;;  %v2848_v3 = vld [vmem:[#allocation25_spill] sm:$0xff]  ;;  %v2849_v4 = vld [vmem:[#allocation26_spill] sm:$0xff] }
 0x1b2   :  { %894 = vmatpush.msrb.mxu0 %v1771_v5  ;;  %914 = vmatpush.msrb.mxu1 %v1773_v6  ;;  %v2850_v5 = vld [vmem:[#allocation27_spill] sm:$0xff]  ;;  %v2851_v6 = vld [vmem:[#allocation28_spill] sm:$0xff] }
 0x1b3   :  { %934 = vmatpush.msrb.mxu2 %v1777_v7  ;;  %954 = vmatpush.msrb.mxu3 %v1779_v8  ;;  %v2852_v7 = vld [vmem:[#allocation29_spill] sm:$0xff]  ;;  %v2853_v8 = vld [vmem:[#allocation30_spill] sm:$0xff] }
 0x1b4   :  { %895 = vmatpush.msrb.mxu0 %v1783_v9  ;;  %915 = vmatpush.msrb.mxu1 %v1785_v10  ;;  %v2854_v9 = vld [vmem:[#allocation31_spill] sm:$0xff]  ;;  %v2855_v10 = vld [vmem:[#allocation32_spill] sm:$0xff] }
 0x1b5   :  { %935 = vmatpush.msrb.mxu2 %v1789_v11  ;;  %955 = vmatpush.msrb.mxu3 %v1791_v12  ;;  %v2856_v11 = vld [vmem:[#allocation33_spill] sm:$0xff]  ;;  %v2857_v12 = vld [vmem:[#allocation34_spill] sm:$0xff] }
 0x1b6   :  { %896 = vmatpush.msrb.mxu0 %v1798_v14  ;;  %916 = vmatpush.msrb.mxu1 %v1800_v15  ;;  %v2858_v14 = vld [vmem:[#allocation35_spill] sm:$0xff]  ;;  %v2859_v15 = vld [vmem:[#allocation36_spill] sm:$0xff] }
 0x1b7   :  { %936 = vmatpush.msrb.mxu2 %v1803_v16  ;;  %956 = vmatpush.msrb.mxu3 %v1805_v17  ;;  %v2860_v16 = vld [vmem:[#allocation37_spill] sm:$0xff]  ;;  %v2861_v17 = vld [vmem:[#allocation38_spill] sm:$0xff] }
 0x1b8   :  { %897 = vmatpush.msrb.mxu0 %v1807_v18  ;;  %917 = vmatpush.msrb.mxu1 %v1809_v19  ;;  %v2862_v18 = vld [vmem:[#allocation39_spill] sm:$0xff]  ;;  %v2863_v19 = vld [vmem:[#allocation40_spill] sm:$0xff] }
 0x1b9   :  { %937 = vmatpush.msrb.mxu2 %v1813_v20  ;;  %957 = vmatpush.msrb.mxu3 %v1815_v21  ;;  %v2864_v20 = vld [vmem:[#allocation41_spill] sm:$0xff]  ;;  %v2865_v21 = vld [vmem:[#allocation42_spill] sm:$0xff] }
 0x1ba   :  { %898 = vmatpush.msrb.mxu0 %v1819_v22  ;;  %918 = vmatpush.msrb.mxu1 %v1821_v23 }
 0x1bb   :  { %938 = vmatpush.msrb.mxu2 %v1825_v24  ;;  %958 = vmatpush.msrb.mxu3 %v1827_v25  ;;  %v2866_v24 = vld [vmem:[#allocation47_spill] sm:$0xff] }
 0x1bc   :  { %899 = vmatpush.msrb.mxu0 %v1834_v27  ;;  %919 = vmatpush.msrb.mxu1 %v1836_v28  ;;  %v2867_v27 = vld [vmem:[#allocation48_spill] sm:$0xff] }
 0x1bd   :  { %939 = vmatpush.msrb.mxu2 %v1839_v29  ;;  %959 = vmatpush.msrb.mxu3 %v1841_v30 }
 0x1be   :  { %900 = vmatpush.msrb.mxu0 %v1843_v31  ;;  %920 = vmatpush.msrb.mxu1 %v1845_v32 }
 0x1bf   :  { %940 = vmatpush.msrb.mxu2 %v1849_v33  ;;  %960 = vmatpush.msrb.mxu3 %v1851_v34  ;;  %v2868_v33 = vld [vmem:[#allocation49_spill] sm:$0xff] }
 0x1c0   :  { %901 = vmatpush.msrb.mxu0 %v1855_v35  ;;  %921 = vmatpush.msrb.mxu1 %v1857_v36  ;;  %v2869_v35 = vld [vmem:[#allocation50_spill] sm:$0xff] }
 0x1c1   :  { %941 = vmatpush.msrb.mxu2 %v1861_v37  ;;  %961 = vmatpush.msrb.mxu3 %v1863_v38 }
 0x1c2   :  { %902 = vmatpush.msrb.mxu0 %v1870_v40  ;;  %922 = vmatpush.msrb.mxu1 %v1872_v41 }
 0x1c3   :  { %942 = vmatpush.msrb.mxu2 %v1875_v42  ;;  %962 = vmatpush.msrb.mxu3 %v1877_v43 }
 0x1c4   :  { %903 = vmatpush.msrb.mxu0 %v2818_v48  ;;  %923 = vmatpush.msrb.mxu1 %v2819_v56 }
 0x1c5   :  { %943 = vmatpush.msrb.mxu2 %v2820_v59  ;;  %963 = vmatpush.msrb.mxu3 %v2821_v60 }
 0x1c6   :  { %904 = vmatpush.msrb.mxu0 %v2846_v1  ;;  %924 = vmatpush.msrb.mxu1 %v2847_v2  ;;  %v2354_v1 = vld [vmem:[#allocation10 + $0x190] sm:$0xff]  ;;  %v2357_v2 = vld [vmem:[#allocation10 + $0x198] sm:$0xff] }
 0x1c7   :  { %944 = vmatpush.msrb.mxu2 %v2848_v3  ;;  %964 = vmatpush.msrb.mxu3 %v2849_v4  ;;  %v2360_v3 = vld [vmem:[#allocation10 + $0x160] sm:$0xff]  ;;  %v2363_v4 = vld [vmem:[#allocation10 + $0x168] sm:$0xff] }
 0x1c8   :  { %905 = vmatpush.msrb.mxu0 %v2850_v5  ;;  %925 = vmatpush.msrb.mxu1 %v2851_v6  ;;  %v2366_v5 = vld [vmem:[#allocation10 + $0x170] sm:$0xff]  ;;  %v2369_v6 = vld [vmem:[#allocation10 + $0x178] sm:$0xff] }
 0x1c9   :  { %945 = vmatpush.msrb.mxu2 %v2852_v7  ;;  %965 = vmatpush.msrb.mxu3 %v2853_v8  ;;  %v2372_v7 = vld [vmem:[#allocation10 + $0x140] sm:$0xff]  ;;  %v2375_v8 = vld [vmem:[#allocation10 + $0x148] sm:$0xff] }
 0x1ca   :  { %906 = vmatpush.msrb.mxu0 %v2854_v9  ;;  %926 = vmatpush.msrb.mxu1 %v2855_v10  ;;  %v2378_v9 = vld [vmem:[#allocation10 + $0x150] sm:$0xff]  ;;  %v2381_v10 = vld [vmem:[#allocation10 + $0x158] sm:$0xff] }
 0x1cb   :  { %946 = vmatpush.msrb.mxu2 %v2856_v11  ;;  %966 = vmatpush.msrb.mxu3 %v2857_v12  ;;  %v2384_v11 = vld [vmem:[#allocation10 + $0x120] sm:$0xff]  ;;  %v2387_v12 = vld [vmem:[#allocation10 + $0x128] sm:$0xff] }
 0x1cc   :  { %907 = vmatpush.msrb.mxu0 %v2858_v14  ;;  %927 = vmatpush.msrb.mxu1 %v2859_v15  ;;  %v2390_v14 = vld [vmem:[#allocation10 + $0x130] sm:$0xff]  ;;  %v2393_v15 = vld [vmem:[#allocation10 + $0x138] sm:$0xff] }
 0x1cd   :  { %947 = vmatpush.msrb.mxu2 %v2860_v16  ;;  %967 = vmatpush.msrb.mxu3 %v2861_v17  ;;  %v2396_v16 = vld [vmem:[#allocation10 + $0x100] sm:$0xff]  ;;  %v2399_v17 = vld [vmem:[#allocation10 + $0x108] sm:$0xff] }
 0x1ce   :  { %908 = vmatpush.msrb.mxu0 %v2862_v18  ;;  %928 = vmatpush.msrb.mxu1 %v2863_v19  ;;  %v2402_v18 = vld [vmem:[#allocation10 + $0x110] sm:$0xff]  ;;  %v2405_v19 = vld [vmem:[#allocation10 + $0x118] sm:$0xff] }
 0x1cf   :  { %948 = vmatpush.msrb.mxu2 %v2864_v20  ;;  %968 = vmatpush.msrb.mxu3 %v2865_v21  ;;  %v2408_v20 = vld [vmem:[#allocation10 + $0xe0] sm:$0xff]  ;;  %v2411_v21 = vld [vmem:[#allocation10 + $0xe8] sm:$0xff] }
 0x22b   :  { %v692_v22 = vpop.f32.mrf.mxu0  ;;  %v712_v23 = vpop.f32.mrf.mxu1 }
 0x22c   :  { %v755_v25 = vadd.f32 %v692_v22, %v2866_v24  ;;  %v756_v28 = vadd.f32 %v712_v23, %v2867_v27  ;;  %v2414_v22 = vld [vmem:[#allocation10 + $0xf0] sm:$0xff]  ;;  %v2417_v23 = vld [vmem:[#allocation10 + $0xf8] sm:$0xff]  ;;  %v2420_v24 = vld [vmem:[#allocation10 + $0xc0] sm:$0xff] }
 0x22d   :  { %v2426_v27 = vld [vmem:[#allocation10 + $0xd0] sm:$0xff] }
 0x22e   :  { %v759_v29 = vmul.f32 0.5, %v755_v25  ;;  %v763_v30 = vmul.f32 0.5, %v756_v28  ;;  %v2423_v25 = vld [vmem:[#allocation10 + $0xc8] sm:$0xff]  ;;  %v2429_v28 = vld [vmem:[#allocation10 + $0xd8] sm:$0xff] }
 0x230   :  { %1426 = vtanh.f32 %v759_v29  ;;  %v2432_v29 = vld [vmem:[#allocation10 + $0xa0] sm:$0xff] }
 0x231   :  { %1428 = vtanh.f32 %v763_v30  ;;  %v2435_v30 = vld [vmem:[#allocation10 + $0xa8] sm:$0xff] }
 0x232   :  { %v732_v31 = vpop.f32.mrf.mxu2  ;;  %v752_v32 = vpop.f32.mrf.mxu3 }
 0x233   :  { %v757_v34 = vadd.f32 %v732_v31, %v2868_v33  ;;  %v758_v36 = vadd.f32 %v752_v32, %v2869_v35  ;;  %v2438_v31 = vld [vmem:[#allocation10 + $0xb0] sm:$0xff]  ;;  %v2441_v32 = vld [vmem:[#allocation10 + $0xb8] sm:$0xff]  ;;  %v2444_v33 = vld [vmem:[#allocation10 + $0x80] sm:$0xff] }
 0x234   :  { %2870 = vst [vmem:[#allocation19_spill] sm:$0xff] %v2444_v33  ;;  %v2450_v35 = vld [vmem:[#allocation10 + $0x90] sm:$0xff] }
 0x235   :  { %1430 = vtanh.f32 %v757_v34  ;;  %v768_v37 = vmul.f32 0.5, %v758_v36  ;;  %v2447_v34 = vld [vmem:[#allocation10 + $0x88] sm:$0xff]  ;;  %2872 = vst [vmem:[#allocation21_spill] sm:$0xff] %v2450_v35  ;;  %v2453_v36 = vld [vmem:[#allocation10 + $0x98] sm:$0xff] }
 0x236   :  { %v1427_v38 = vpop.eup %1426  ;;  %2871 = vst [vmem:[#allocation20_spill] sm:$0xff] %v2447_v34 }
 0x237   :  { %v1429_v40 = vpop.eup %1428  ;;  %v761_v41 = vmul.f32 0.5, %v1427_v38  ;;  %1432 = vtanh.f32 %v768_v37  ;;  %2873 = vst [vmem:[#allocation22_spill] sm:$0xff] %v2453_v36  ;;  %v2456_v37 = vld [vmem:[#allocation10 + $0x60] sm:$0xff]  ;;  %v2459_v38 = vld [vmem:[#allocation10 + $0x68] sm:$0xff] }
 0x238   :  { %v765_v42 = vmul.f32 0.5, %v1429_v40  ;;  %2874 = vst [vmem:[#allocation43_spill] sm:$0xff] %v2456_v37  ;;  %v2462_v40 = vld [vmem:[#allocation10 + $0x70] sm:$0xff] }
 0x239   :  { %v762_v43 = vadd.f32 0.5, %v761_v41  ;;  %2875 = vst [vmem:[#allocation44_spill] sm:$0xff] %v2459_v38  ;;  %v2465_v41 = vld [vmem:[#allocation10 + $0x78] sm:$0xff] }
 0x23a   :  { %v766_v63 = vadd.f32 0.5, %v765_v42  ;;  %2876 = vst [vmem:[#allocation45_spill] sm:$0xff] %v2462_v40  ;;  %v2468_v42 = vld [vmem:[#allocation10 + $0x40] sm:$0xff] }
 0x23b   :  { %v1431_v0 = vpop.eup %1430  ;;  %2877 = vst [vmem:[#allocation46_spill] sm:$0xff] %v2465_v41 }
 0x23c   :  { %v772_v48 = vmul.f32 %v766_v63, %v2237_v44  ;;  %v773_v56 = vmul.f32 %v1431_v0, %v762_v43  ;;  %v2339_v44 = vld [vmem:[#allocation10 + $0x1a8] sm:$0xff]  ;;  %2878 = vst [vmem:[#allocation23_spill] sm:$0xff] %v2468_v42  ;;  %v2474_v63 = vld [vmem:[#allocation10 + $0x50] sm:$0xff]  ;;  %v2477_v0 = vld [vmem:[#allocation10 + $0x58] sm:$0xff] }
 0x23d   :  { %v1433_v59 = vpop.eup %1432  ;;  %v2471_v43 = vld [vmem:[#allocation10 + $0x48] sm:$0xff]  ;;  %2880 = vst [vmem:[#allocation25_spill] sm:$0xff] %v2474_v63 }
 0x23e   :  { %v2309_v60 = vadd.f32 %v773_v56, %v772_v48  ;;  %v770_v13 = vmul.f32 0.5, %v1433_v59  ;;  %2879 = vst [vmem:[#allocation24_spill] sm:$0xff] %v2471_v43  ;;  %v2480_v48 = vld [vmem:[#allocation10 + $0x20] sm:$0xff]  ;;  %v2483_v56 = vld [vmem:[#allocation10 + $0x28] sm:$0xff]  ;;  %v2486_v59 = vld [vmem:[#allocation10 + $0x30] sm:$0xff] }
 0x23f   :  { %2881 = vst [vmem:[#allocation26_spill] sm:$0xff] %v2477_v0 }
 0x240   :  { %1434 = vtanh.f32 %v2309_v60  ;;  %v771_v49 = vadd.f32 0.5, %v770_v13  ;;  %2882 = vst [vmem:[#allocation27_spill] sm:$0xff] %v2480_v48  ;;  %v2489_v13 = vld [vmem:[#allocation10 + $0x38] sm:$0xff] }
 0x241   :  { %2883 = vst [vmem:[#allocation28_spill] sm:$0xff] %v2483_v56 }
 0x242   :  { %2884 = vst [vmem:[#allocation29_spill] sm:$0xff] %v2486_v59 }
 0x243   :  { %2885 = vst [vmem:[#allocation30_spill] sm:$0xff] %v2489_v13 }
 0x246   :  { %v1435_v47 = vpop.eup %1434 }
 0x247   :  { %v776_v51 = vmul.f32 %v1435_v47, %v771_v49  ;;  %v2492_v49 = vld [vmem:[#allocation10] sm:$0xff]  ;;  %v2495_v47 = vld [vmem:[#allocation10 + $0x8] sm:$0xff] }
 0x248   :  { %2886 = vst [vmem:[#allocation31_spill] sm:$0xff] %v2492_v49 }
 0x249   :  { %800 = vmatmul.f32.vlgmr.msra.gmra.mxu0 %v776_v51  ;;  %820 = vmatmul.f32.vlgmr.msra.gmra.mxu1 %v776_v51  ;;  %2887 = vst [vmem:[#allocation32_spill] sm:$0xff] %v2495_v47 }
 0x24a   :  { %840 = vmatmul.f32.vlgmr.msra.gmra.mxu2 %v776_v51  ;;  %860 = vmatmul.f32.vlgmr.msra.gmra.mxu3 %v776_v51  ;;  %v2498_v51 = vld [vmem:[#allocation10 + $0x10] sm:$0xff] }
 0x24b   :  { %1002 = vmatpush.msra.mxu0 %v2312_v62  ;;  %1022 = vmatpush.msra.mxu1 %v2315_v52  ;;  %2888 = vst [vmem:[#allocation33_spill] sm:$0xff] %v2498_v51 }
 0x24c   :  { %1042 = vmatpush.msra.mxu2 %v2318_v46  ;;  %1062 = vmatpush.msra.mxu3 %v2321_v45 }
 0x24d   :  { %1003 = vmatpush.msra.mxu0 %v2324_v58  ;;  %1023 = vmatpush.msra.mxu1 %v2327_v54 }
 0x24e   :  { %1043 = vmatpush.msra.mxu2 %v2330_v61  ;;  %1063 = vmatpush.msra.mxu3 %v2333_v50 }
 0x24f   :  { %1004 = vmatpush.msra.mxu0 %v2336_v39  ;;  %1024 = vmatpush.msra.mxu1 %v2339_v44 }
 0x250   :  { %1044 = vmatpush.msra.mxu2 %v2342_v55  ;;  %1064 = vmatpush.msra.mxu3 %v2345_v26 }
 0x251   :  { %1005 = vmatpush.msra.mxu0 %v2348_v57  ;;  %1025 = vmatpush.msra.mxu1 %v2351_v53 }
 0x252   :  { %1045 = vmatpush.msra.mxu2 %v2354_v1  ;;  %1065 = vmatpush.msra.mxu3 %v2357_v2 }
 0x253   :  { %1006 = vmatpush.msra.mxu0 %v2360_v3  ;;  %1026 = vmatpush.msra.mxu1 %v2363_v4 }
 0x254   :  { %1046 = vmatpush.msra.mxu2 %v2366_v5  ;;  %1066 = vmatpush.msra.mxu3 %v2369_v6 }
 0x255   :  { %1007 = vmatpush.msra.mxu0 %v2372_v7  ;;  %1027 = vmatpush.msra.mxu1 %v2375_v8 }
 0x256   :  { %1047 = vmatpush.msra.mxu2 %v2378_v9  ;;  %1067 = vmatpush.msra.mxu3 %v2381_v10 }
 0x257   :  { %1008 = vmatpush.msra.mxu0 %v2384_v11  ;;  %1028 = vmatpush.msra.mxu1 %v2387_v12 }
 0x258   :  { %1048 = vmatpush.msra.mxu2 %v2390_v14  ;;  %1068 = vmatpush.msra.mxu3 %v2393_v15 }
 0x259   :  { %1009 = vmatpush.msra.mxu0 %v2396_v16  ;;  %1029 = vmatpush.msra.mxu1 %v2399_v17 }
 0x25a   :  { %1049 = vmatpush.msra.mxu2 %v2402_v18  ;;  %1069 = vmatpush.msra.mxu3 %v2405_v19 }
 0x25b   :  { %1010 = vmatpush.msra.mxu0 %v2408_v20  ;;  %1030 = vmatpush.msra.mxu1 %v2411_v21 }
 0x25c   :  { %1050 = vmatpush.msra.mxu2 %v2414_v22  ;;  %1070 = vmatpush.msra.mxu3 %v2417_v23 }
 0x25d   :  { %1011 = vmatpush.msra.mxu0 %v2420_v24  ;;  %1031 = vmatpush.msra.mxu1 %v2423_v25 }
 0x25e   :  { %1051 = vmatpush.msra.mxu2 %v2426_v27  ;;  %1071 = vmatpush.msra.mxu3 %v2429_v28 }
 0x25f   :  { %1012 = vmatpush.msra.mxu0 %v2432_v29  ;;  %1032 = vmatpush.msra.mxu1 %v2435_v30 }
 0x260   :  { %1052 = vmatpush.msra.mxu2 %v2438_v31  ;;  %1072 = vmatpush.msra.mxu3 %v2441_v32 }
 0x261   :  { %1013 = vmatpush.msra.mxu0 %v2444_v33  ;;  %1033 = vmatpush.msra.mxu1 %v2447_v34 }
 0x262   :  { %1053 = vmatpush.msra.mxu2 %v2450_v35  ;;  %1073 = vmatpush.msra.mxu3 %v2453_v36 }
 0x263   :  { %1014 = vmatpush.msra.mxu0 %v2456_v37  ;;  %1034 = vmatpush.msra.mxu1 %v2459_v38  ;;  %v2893_v37 = vld [vmem:[#allocation54_spill] sm:$0xff] }
 0x264   :  { %1054 = vmatpush.msra.mxu2 %v2462_v40  ;;  %1074 = vmatpush.msra.mxu3 %v2465_v41  ;;  %v2892_v40 = vld [vmem:[#allocation53_spill] sm:$0xff] }
 0x265   :  { %1015 = vmatpush.msra.mxu0 %v2468_v42  ;;  %1035 = vmatpush.msra.mxu1 %v2471_v43 }
 0x266   :  { %1055 = vmatpush.msra.mxu2 %v2474_v63  ;;  %1075 = vmatpush.msra.mxu3 %v2477_v0  ;;  %v2890_v0 = vld [vmem:[#allocation51_spill] sm:$0xff]  ;;  %v2891_v63 = vld [vmem:[#allocation52_spill] sm:$0xff] }
 0x267   :  { %1016 = vmatpush.msra.mxu0 %v2480_v48  ;;  %1036 = vmatpush.msra.mxu1 %v2483_v56  ;;  %v2501_v56 = vld [vmem:[#allocation10 + $0x18] sm:$0xff] }
 0x268   :  { %1056 = vmatpush.msra.mxu2 %v2486_v59  ;;  %1076 = vmatpush.msra.mxu3 %v2489_v13  ;;  %2889 = vst [vmem:[#allocation34_spill] sm:$0xff] %v2501_v56 }
 0x269   :  { %1017 = vmatpush.msra.mxu0 %v2492_v49  ;;  %1037 = vmatpush.msra.mxu1 %v2495_v47 }
 0x26a   :  { %1057 = vmatpush.msra.mxu2 %v2498_v51  ;;  %1077 = vmatpush.msra.mxu3 %v2501_v56 }
 0x2c6   :  { %v801_v59 = vpop.f32.mrf.mxu0  ;;  %v821_v48 = vpop.f32.mrf.mxu1 }
 0x2c7   :  { %v864_v13 = vadd.f32 %v801_v59, %v2890_v0  ;;  %v865_v43 = vadd.f32 %v821_v48, %v2891_v63 }
 0x2c9   :  { %v868_v42 = vmul.f32 0.5, %v864_v13  ;;  %v872_v49 = vmul.f32 0.5, %v865_v43 }
 0x2cb   :  { %1436 = vtanh.f32 %v868_v42 }
 0x2cc   :  { %1438 = vtanh.f32 %v872_v49  ;;  %v2900_v49 = vld [vmem:[#allocation45_spill] sm:$0xff] }
 0x2cd   :  { %v841_v41 = vpop.f32.mrf.mxu2  ;;  %v861_v47 = vpop.f32.mrf.mxu3 }
 0x2ce   :  { %v866_v38 = vadd.f32 %v841_v41, %v2892_v40  ;;  %v867_v51 = vadd.f32 %v861_v47, %v2893_v37  ;;  %v2901_v47 = vld [vmem:[#allocation46_spill] sm:$0xff] }
 0x2d0   :  { %1440 = vtanh.f32 %v866_v38  ;;  %v877_v36 = vmul.f32 0.5, %v867_v51  ;;  %v2902_v51 = vld [vmem:[#allocation23_spill] sm:$0xff] }
 0x2d1   :  { %v1437_v35 = vpop.eup %1436 }
 0x2d2   :  { %v1439_v56 = vpop.eup %1438  ;;  %v870_v34 = vmul.f32 0.5, %v1437_v35  ;;  %1442 = vtanh.f32 %v877_v36  ;;  %v2897_v35 = vld [vmem:[#allocation22_spill] sm:$0xff]  ;;  %v2898_v36 = vld [vmem:[#allocation43_spill] sm:$0xff] }
 0x2d3   :  { %v874_v33 = vmul.f32 0.5, %v1439_v56  ;;  %v2899_v56 = vld [vmem:[#allocation44_spill] sm:$0xff] }
 0x2d4   :  { %v871_v0 = vadd.f32 0.5, %v870_v34  ;;  %v2896_v34 = vld [vmem:[#allocation21_spill] sm:$0xff] }
 0x2d5   :  { %v875_v59 = vadd.f32 0.5, %v874_v33  ;;  %v2895_v33 = vld [vmem:[#allocation20_spill] sm:$0xff] }
 0x2d6   :  { %v1441_v63 = vpop.eup %1440 }
 0x2d7   :  { %v881_v43 = vmul.f32 %v875_v59, %v2309_v60  ;;  %v882_v42 = vmul.f32 %v1441_v63, %v871_v0  ;;  %v2894_v60 = vld [vmem:[#allocation19_spill] sm:$0xff]  ;;  %v2903_v0 = vld [vmem:[#allocation24_spill] sm:$0xff]  ;;  %v2904_v59 = vld [vmem:[#allocation25_spill] sm:$0xff] }
 0x2d8   :  { %v1443_v48 = vpop.eup %1442  ;;  %v2905_v63 = vld [vmem:[#allocation26_spill] sm:$0xff] }
 0x2d9   :  { %v2509_v13 = vadd.f32 %v882_v42, %v881_v43  ;;  %v879_v40 = vmul.f32 0.5, %v1443_v48  ;;  %v2906_v43 = vld [vmem:[#allocation27_spill] sm:$0xff]  ;;  %v2907_v42 = vld [vmem:[#allocation28_spill] sm:$0xff]  ;;  %v2908_v48 = vld [vmem:[#allocation29_spill] sm:$0xff] }
 0x2db   :  { %1444 = vtanh.f32 %v2509_v13  ;;  %v880_v37 = vadd.f32 0.5, %v879_v40  ;;  %v2909_v40 = vld [vmem:[#allocation30_spill] sm:$0xff] }
 0x2e1   :  { %v1445_v38 = vpop.eup %1444 }
 0x2e2   :  { %v885_v41 = vmul.f32 %v1445_v38, %v880_v37  ;;  %v2910_v37 = vld [vmem:[#allocation31_spill] sm:$0xff]  ;;  %v2911_v38 = vld [vmem:[#allocation32_spill] sm:$0xff] }
 0x2e4   :  { %909 = vmatmul.f32.vlgmr.msrb.gmra.mxu0 %v885_v41  ;;  %929 = vmatmul.f32.vlgmr.msrb.gmra.mxu1 %v885_v41 }
 0x2e5   :  { %949 = vmatmul.f32.vlgmr.msrb.gmra.mxu2 %v885_v41  ;;  %969 = vmatmul.f32.vlgmr.msrb.gmra.mxu3 %v885_v41  ;;  %v2912_v41 = vld [vmem:[#allocation33_spill] sm:$0xff] }
 0x2e6   :  { %1111 = vmatpush.msrb.mxu0 %v2312_v62  ;;  %1131 = vmatpush.msrb.mxu1 %v2315_v52 }
 0x2e7   :  { %1151 = vmatpush.msrb.mxu2 %v2318_v46  ;;  %1171 = vmatpush.msrb.mxu3 %v2321_v45 }
 0x2e8   :  { %1112 = vmatpush.msrb.mxu0 %v2324_v58  ;;  %1132 = vmatpush.msrb.mxu1 %v2327_v54 }
 0x2e9   :  { %1152 = vmatpush.msrb.mxu2 %v2330_v61  ;;  %1172 = vmatpush.msrb.mxu3 %v2333_v50 }
 0x2ea   :  { %1113 = vmatpush.msrb.mxu0 %v2336_v39  ;;  %1133 = vmatpush.msrb.mxu1 %v2339_v44 }
 0x2eb   :  { %1153 = vmatpush.msrb.mxu2 %v2342_v55  ;;  %1173 = vmatpush.msrb.mxu3 %v2345_v26 }
 0x2ec   :  { %1114 = vmatpush.msrb.mxu0 %v2348_v57  ;;  %1134 = vmatpush.msrb.mxu1 %v2351_v53 }
 0x2ed   :  { %1154 = vmatpush.msrb.mxu2 %v2354_v1  ;;  %1174 = vmatpush.msrb.mxu3 %v2357_v2 }
 0x2ee   :  { %1115 = vmatpush.msrb.mxu0 %v2360_v3  ;;  %1135 = vmatpush.msrb.mxu1 %v2363_v4 }
 0x2ef   :  { %1155 = vmatpush.msrb.mxu2 %v2366_v5  ;;  %1175 = vmatpush.msrb.mxu3 %v2369_v6 }
 0x2f0   :  { %1116 = vmatpush.msrb.mxu0 %v2372_v7  ;;  %1136 = vmatpush.msrb.mxu1 %v2375_v8 }
 0x2f1   :  { %1156 = vmatpush.msrb.mxu2 %v2378_v9  ;;  %1176 = vmatpush.msrb.mxu3 %v2381_v10 }
 0x2f2   :  { %1117 = vmatpush.msrb.mxu0 %v2384_v11  ;;  %1137 = vmatpush.msrb.mxu1 %v2387_v12 }
 0x2f3   :  { %1157 = vmatpush.msrb.mxu2 %v2390_v14  ;;  %1177 = vmatpush.msrb.mxu3 %v2393_v15 }
 0x2f4   :  { %1118 = vmatpush.msrb.mxu0 %v2396_v16  ;;  %1138 = vmatpush.msrb.mxu1 %v2399_v17 }
 0x2f5   :  { %1158 = vmatpush.msrb.mxu2 %v2402_v18  ;;  %1178 = vmatpush.msrb.mxu3 %v2405_v19 }
 0x2f6   :  { %1119 = vmatpush.msrb.mxu0 %v2408_v20  ;;  %1139 = vmatpush.msrb.mxu1 %v2411_v21 }
 0x2f7   :  { %1159 = vmatpush.msrb.mxu2 %v2414_v22  ;;  %1179 = vmatpush.msrb.mxu3 %v2417_v23 }
 0x2f8   :  { %1120 = vmatpush.msrb.mxu0 %v2420_v24  ;;  %1140 = vmatpush.msrb.mxu1 %v2423_v25 }
 0x2f9   :  { %1160 = vmatpush.msrb.mxu2 %v2426_v27  ;;  %1180 = vmatpush.msrb.mxu3 %v2429_v28 }
 0x2fa   :  { %1121 = vmatpush.msrb.mxu0 %v2432_v29  ;;  %1141 = vmatpush.msrb.mxu1 %v2435_v30 }
 0x2fb   :  { %1161 = vmatpush.msrb.mxu2 %v2438_v31  ;;  %1181 = vmatpush.msrb.mxu3 %v2441_v32 }
 0x2fc   :  { %1122 = vmatpush.msrb.mxu0 %v2894_v60  ;;  %1142 = vmatpush.msrb.mxu1 %v2895_v33 }
 0x2fd   :  { %1162 = vmatpush.msrb.mxu2 %v2896_v34  ;;  %1182 = vmatpush.msrb.mxu3 %v2897_v35  ;;  %v2917_v35 = vld [vmem:[#allocation58_spill] sm:$0xff] }
 0x2fe   :  { %1123 = vmatpush.msrb.mxu0 %v2898_v36  ;;  %1143 = vmatpush.msrb.mxu1 %v2899_v56  ;;  %v2916_v36 = vld [vmem:[#allocation57_spill] sm:$0xff] }
 0x2ff   :  { %1163 = vmatpush.msrb.mxu2 %v2900_v49  ;;  %1183 = vmatpush.msrb.mxu3 %v2901_v47  ;;  %v2914_v47 = vld [vmem:[#allocation55_spill] sm:$0xff]  ;;  %v2915_v49 = vld [vmem:[#allocation56_spill] sm:$0xff] }
 0x300   :  { %1124 = vmatpush.msrb.mxu0 %v2902_v51  ;;  %1144 = vmatpush.msrb.mxu1 %v2903_v0  ;;  %v2913_v51 = vld [vmem:[#allocation34_spill] sm:$0xff] }
 0x301   :  { %1164 = vmatpush.msrb.mxu2 %v2904_v59  ;;  %1184 = vmatpush.msrb.mxu3 %v2905_v63 }
 0x302   :  { %1125 = vmatpush.msrb.mxu0 %v2906_v43  ;;  %1145 = vmatpush.msrb.mxu1 %v2907_v42 }
 0x303   :  { %1165 = vmatpush.msrb.mxu2 %v2908_v48  ;;  %1185 = vmatpush.msrb.mxu3 %v2909_v40 }
 0x304   :  { %1126 = vmatpush.msrb.mxu0 %v2910_v37  ;;  %1146 = vmatpush.msrb.mxu1 %v2911_v38 }
 0x305   :  { %1166 = vmatpush.msrb.mxu2 %v2912_v41  ;;  %1186 = vmatpush.msrb.mxu3 %v2913_v51 }
 0x361   :  { %v910_v0 = vpop.f32.mrf.mxu0  ;;  %v930_v59 = vpop.f32.mrf.mxu1 }
 0x362   :  { %v973_v63 = vadd.f32 %v910_v0, %v2914_v47  ;;  %v974_v43 = vadd.f32 %v930_v59, %v2915_v49 }
 0x364   :  { %v977_v56 = vmul.f32 0.5, %v973_v63  ;;  %v981_v42 = vmul.f32 0.5, %v974_v43 }
 0x366   :  { %1446 = vtanh.f32 %v977_v56 }
 0x367   :  { %1448 = vtanh.f32 %v981_v42 }
 0x368   :  { %v950_v48 = vpop.f32.mrf.mxu2  ;;  %v970_v40 = vpop.f32.mrf.mxu3 }
 0x369   :  { %v975_v37 = vadd.f32 %v950_v48, %v2916_v36  ;;  %v976_v38 = vadd.f32 %v970_v40, %v2917_v35 }
 0x36b   :  { %1450 = vtanh.f32 %v975_v37  ;;  %v986_v41 = vmul.f32 0.5, %v976_v38  ;;  %v1342_v37 = vld [vmem:[#allocation13 + $0x78] sm:$0xff] }
 0x36c   :  { %v1447_v34 = vpop.eup %1446 }
 0x36d   :  { %v1449_v51 = vpop.eup %1448  ;;  %v979_v33 = vmul.f32 0.5, %v1447_v34  ;;  %1452 = vtanh.f32 %v986_v41 }
 0x36e   :  { %v983_v60 = vmul.f32 0.5, %v1449_v51 }
 0x36f   :  { %v980_v47 = vadd.f32 0.5, %v979_v33 }
 0x370   :  { %v984_v0 = vadd.f32 0.5, %v983_v60 }
 0x371   :  { %v1451_v49 = vpop.eup %1450 }
 0x372   :  { %v990_v59 = vmul.f32 %v984_v0, %v2509_v13  ;;  %v991_v56 = vmul.f32 %v1451_v49, %v980_v47  ;;  %v2942_v47 = vld [vmem:[#allocation63_spill] sm:$0xff]  ;;  %v2943_v49 = vld [vmem:[#allocation64_spill] sm:$0xff] }
 0x373   :  { %v1453_v63 = vpop.eup %1452 }
 0x374   :  { %v2581_v43 = vadd.f32 %v991_v56, %v990_v59  ;;  %v988_v36 = vmul.f32 0.5, %v1453_v63 }
 0x376   :  { %1454 = vtanh.f32 %v2581_v43  ;;  %v989_v35 = vadd.f32 0.5, %v988_v36 }
 0x37c   :  { %v1455_v42 = vpop.eup %1454 }
 0x37d   :  { %v994_v48 = vmul.f32 %v1455_v42, %v989_v35  ;;  %v2944_v35 = vld [vmem:[#allocation65_spill] sm:$0xff] }
 0x37f   :  { %1018 = vmatmul.f32.vlgmr.msra.gmra.mxu0 %v994_v48  ;;  %1038 = vmatmul.f32.vlgmr.msra.gmra.mxu1 %v994_v48 }
 0x380   :  { %1058 = vmatmul.f32.vlgmr.msra.gmra.mxu2 %v994_v48  ;;  %1078 = vmatmul.f32.vlgmr.msra.gmra.mxu3 %v994_v48  ;;  %v2945_v48 = vld [vmem:[#allocation66_spill] sm:$0xff] }
 0x381   :  { %1220 = vmatpush.msra.mxu0 %v2312_v62  ;;  %1240 = vmatpush.msra.mxu1 %v2315_v52  ;;  %v2918_v62 = vld [vmem:[#allocation19_spill] sm:$0xff]  ;;  %v2919_v52 = vld [vmem:[#allocation20_spill] sm:$0xff] }
 0x382   :  { %1260 = vmatpush.msra.mxu2 %v2318_v46  ;;  %1280 = vmatpush.msra.mxu3 %v2321_v45  ;;  %v2920_v46 = vld [vmem:[#allocation21_spill] sm:$0xff]  ;;  %v2921_v45 = vld [vmem:[#allocation22_spill] sm:$0xff] }
 0x383   :  { %1221 = vmatpush.msra.mxu0 %v2324_v58  ;;  %1241 = vmatpush.msra.mxu1 %v2327_v54  ;;  %v2922_v58 = vld [vmem:[#allocation43_spill] sm:$0xff]  ;;  %v2923_v54 = vld [vmem:[#allocation44_spill] sm:$0xff] }
 0x384   :  { %1261 = vmatpush.msra.mxu2 %v2330_v61  ;;  %1281 = vmatpush.msra.mxu3 %v2333_v50  ;;  %v2924_v61 = vld [vmem:[#allocation45_spill] sm:$0xff]  ;;  %v2925_v50 = vld [vmem:[#allocation46_spill] sm:$0xff] }
 0x385   :  { %1222 = vmatpush.msra.mxu0 %v2336_v39  ;;  %1242 = vmatpush.msra.mxu1 %v2339_v44  ;;  %v2926_v39 = vld [vmem:[#allocation23_spill] sm:$0xff]  ;;  %v2927_v44 = vld [vmem:[#allocation24_spill] sm:$0xff] }
 0x386   :  { %1262 = vmatpush.msra.mxu2 %v2342_v55  ;;  %1282 = vmatpush.msra.mxu3 %v2345_v26  ;;  %v2928_v55 = vld [vmem:[#allocation25_spill] sm:$0xff]  ;;  %v2929_v26 = vld [vmem:[#allocation26_spill] sm:$0xff] }
 0x387   :  { %1223 = vmatpush.msra.mxu0 %v2348_v57  ;;  %1243 = vmatpush.msra.mxu1 %v2351_v53  ;;  %v2930_v57 = vld [vmem:[#allocation27_spill] sm:$0xff]  ;;  %v2931_v53 = vld [vmem:[#allocation28_spill] sm:$0xff] }
 0x388   :  { %1263 = vmatpush.msra.mxu2 %v2354_v1  ;;  %1283 = vmatpush.msra.mxu3 %v2357_v2  ;;  %v2932_v1 = vld [vmem:[#allocation29_spill] sm:$0xff]  ;;  %v2933_v2 = vld [vmem:[#allocation30_spill] sm:$0xff] }
 0x389   :  { %1224 = vmatpush.msra.mxu0 %v2360_v3  ;;  %1244 = vmatpush.msra.mxu1 %v2363_v4  ;;  %v2934_v3 = vld [vmem:[#allocation31_spill] sm:$0xff]  ;;  %v2935_v4 = vld [vmem:[#allocation32_spill] sm:$0xff] }
 0x38a   :  { %1264 = vmatpush.msra.mxu2 %v2366_v5  ;;  %1284 = vmatpush.msra.mxu3 %v2369_v6  ;;  %v2936_v5 = vld [vmem:[#allocation33_spill] sm:$0xff]  ;;  %v2937_v6 = vld [vmem:[#allocation34_spill] sm:$0xff] }
 0x38b   :  { %1225 = vmatpush.msra.mxu0 %v2372_v7  ;;  %1245 = vmatpush.msra.mxu1 %v2375_v8 }
 0x38c   :  { %1265 = vmatpush.msra.mxu2 %v2378_v9  ;;  %1285 = vmatpush.msra.mxu3 %v2381_v10  ;;  %v2938_v9 = vld [vmem:[#allocation59_spill] sm:$0xff] }
 0x38d   :  { %1226 = vmatpush.msra.mxu0 %v2384_v11  ;;  %1246 = vmatpush.msra.mxu1 %v2387_v12  ;;  %v2939_v11 = vld [vmem:[#allocation60_spill] sm:$0xff] }
 0x38e   :  { %1266 = vmatpush.msra.mxu2 %v2390_v14  ;;  %1286 = vmatpush.msra.mxu3 %v2393_v15 }
 0x38f   :  { %1227 = vmatpush.msra.mxu0 %v2396_v16  ;;  %1247 = vmatpush.msra.mxu1 %v2399_v17 }
 0x390   :  { %1267 = vmatpush.msra.mxu2 %v2402_v18  ;;  %1287 = vmatpush.msra.mxu3 %v2405_v19  ;;  %v2940_v18 = vld [vmem:[#allocation61_spill] sm:$0xff] }
 0x391   :  { %1228 = vmatpush.msra.mxu0 %v2408_v20  ;;  %1248 = vmatpush.msra.mxu1 %v2411_v21  ;;  %v2941_v20 = vld [vmem:[#allocation62_spill] sm:$0xff] }
 0x392   :  { %1268 = vmatpush.msra.mxu2 %v2414_v22  ;;  %1288 = vmatpush.msra.mxu3 %v2417_v23 }
 0x393   :  { %1229 = vmatpush.msra.mxu0 %v2420_v24  ;;  %1249 = vmatpush.msra.mxu1 %v2423_v25 }
 0x394   :  { %1269 = vmatpush.msra.mxu2 %v2426_v27  ;;  %1289 = vmatpush.msra.mxu3 %v2429_v28 }
 0x395   :  { %1230 = vmatpush.msra.mxu0 %v2432_v29  ;;  %1250 = vmatpush.msra.mxu1 %v2435_v30 }
 0x396   :  { %1270 = vmatpush.msra.mxu2 %v2438_v31  ;;  %1290 = vmatpush.msra.mxu3 %v2441_v32 }
 0x397   :  { %1231 = vmatpush.msra.mxu0 %v2918_v62  ;;  %1251 = vmatpush.msra.mxu1 %v2919_v52 }
 0x398   :  { %1271 = vmatpush.msra.mxu2 %v2920_v46  ;;  %1291 = vmatpush.msra.mxu3 %v2921_v45 }
 0x399   :  { %1232 = vmatpush.msra.mxu0 %v2922_v58  ;;  %1252 = vmatpush.msra.mxu1 %v2923_v54 }
 0x39a   :  { %1272 = vmatpush.msra.mxu2 %v2924_v61  ;;  %1292 = vmatpush.msra.mxu3 %v2925_v50 }
 0x39b   :  { %1233 = vmatpush.msra.mxu0 %v2926_v39  ;;  %1253 = vmatpush.msra.mxu1 %v2927_v44 }
 0x39c   :  { %1273 = vmatpush.msra.mxu2 %v2928_v55  ;;  %1293 = vmatpush.msra.mxu3 %v2929_v26 }
 0x39d   :  { %1234 = vmatpush.msra.mxu0 %v2930_v57  ;;  %1254 = vmatpush.msra.mxu1 %v2931_v53 }
 0x39e   :  { %1274 = vmatpush.msra.mxu2 %v2932_v1  ;;  %1294 = vmatpush.msra.mxu3 %v2933_v2 }
 0x39f   :  { %1235 = vmatpush.msra.mxu0 %v2934_v3  ;;  %1255 = vmatpush.msra.mxu1 %v2935_v4  ;;  %v1341_v4 = vld [vmem:[#allocation13 + $0x70] sm:$0xff] }
 0x3a0   :  { %1275 = vmatpush.msra.mxu2 %v2936_v5  ;;  %1295 = vmatpush.msra.mxu3 %v2937_v6  ;;  %v1340_v5 = vld [vmem:[#allocation13 + $0x68] sm:$0xff]  ;;  %v1339_v6 = vld [vmem:[#allocation13 + $0x60] sm:$0xff] }
 0x3fc   :  { %v1019_v7 = vpop.f32.mrf.mxu0  ;;  %v1039_v8 = vpop.f32.mrf.mxu1 }
 0x3fd   :  { %v1082_v10 = vadd.f32 %v1019_v7, %v2938_v9  ;;  %v1083_v12 = vadd.f32 %v1039_v8, %v2939_v11  ;;  %v1338_v7 = vld [vmem:[#allocation13 + $0x58] sm:$0xff]  ;;  %v1337_v8 = vld [vmem:[#allocation13 + $0x50] sm:$0xff]  ;;  %v1336_v9 = vld [vmem:[#allocation13 + $0x48] sm:$0xff] }
 0x3fe   :  { %v1334_v11 = vld [vmem:[#allocation13 + $0x38] sm:$0xff] }
 0x3ff   :  { %v1086_v14 = vmul.f32 0.5, %v1082_v10  ;;  %v1090_v15 = vmul.f32 0.5, %v1083_v12  ;;  %v1335_v10 = vld [vmem:[#allocation13 + $0x40] sm:$0xff]  ;;  %v1333_v12 = vld [vmem:[#allocation13 + $0x30] sm:$0xff] }
 0x401   :  { %1456 = vtanh.f32 %v1086_v14  ;;  %v1332_v14 = vld [vmem:[#allocation13 + $0x28] sm:$0xff] }
 0x402   :  { %1458 = vtanh.f32 %v1090_v15  ;;  %v1331_v15 = vld [vmem:[#allocation13 + $0x20] sm:$0xff] }
 0x403   :  { %v1059_v16 = vpop.f32.mrf.mxu2  ;;  %v1079_v17 = vpop.f32.mrf.mxu3 }
 0x404   :  { %v1084_v19 = vadd.f32 %v1059_v16, %v2940_v18  ;;  %v1085_v21 = vadd.f32 %v1079_v17, %v2941_v20  ;;  %v1330_v16 = vld [vmem:[#allocation13 + $0x18] sm:$0xff]  ;;  %v1329_v17 = vld [vmem:[#allocation13 + $0x10] sm:$0xff]  ;;  %v1328_v18 = vld [vmem:[#allocation13 + $0x8] sm:$0xff] }
 0x406   :  { %1460 = vtanh.f32 %v1084_v19  ;;  %v1095_v22 = vmul.f32 0.5, %v1085_v21  ;;  %v1327_v19 = vld [vmem:[#allocation13] sm:$0xff] }
 0x407   :  { %v1457_v23 = vpop.eup %1456 }
 0x408   :  { %v1459_v24 = vpop.eup %1458  ;;  %v1088_v25 = vmul.f32 0.5, %v1457_v23  ;;  %1462 = vtanh.f32 %v1095_v22  ;;  %v2946_v22 = vld [vmem:[#allocation67_spill] sm:$0xff] }
 0x409   :  { %v1092_v27 = vmul.f32 0.5, %v1459_v24  ;;  %v2947_v24 = vld [vmem:[#allocation68_spill] sm:$0xff] }
 0x40a   :  { %v1089_v28 = vadd.f32 0.5, %v1088_v25 }
 0x40b   :  { %v1093_v29 = vadd.f32 0.5, %v1092_v27 }
 0x40c   :  { %v1461_v30 = vpop.eup %1460 }
 0x40d   :  { %v1099_v31 = vmul.f32 %v1093_v29, %v2581_v43  ;;  %v1100_v32 = vmul.f32 %v1461_v30, %v1089_v28 }
 0x40e   :  { %v1463_v13 = vpop.eup %1462 }
 0x40f   :  { %v1101_v60 = vadd.f32 %v1100_v32, %v1099_v31  ;;  %v1097_v33 = vmul.f32 0.5, %v1463_v13  ;;  %v2948_v31 = vld [vmem:[#allocation69_spill] sm:$0xff]  ;;  %v2949_v13 = vld [vmem:[#allocation70_spill] sm:$0xff] }
 0x411   :  { %1464 = vtanh.f32 %v1101_v60  ;;  %v1098_v34 = vadd.f32 0.5, %v1097_v33 }
 0x417   :  { %v1465_v51 = vpop.eup %1464 }
 0x418   :  { %v1103_v40 = vmul.f32 %v1465_v51, %v1098_v34 }
 0x41a   :  { %1127 = vmatmul.f32.vlgmr.msrb.gmra.mxu0 %v1103_v40  ;;  %1147 = vmatmul.f32.vlgmr.msrb.gmra.mxu1 %v1103_v40 }
 0x41b   :  { %1167 = vmatmul.f32.vlgmr.msrb.gmra.mxu2 %v1103_v40  ;;  %1187 = vmatmul.f32.vlgmr.msrb.gmra.mxu3 %v1103_v40 }
 0x41c   :  { %1347 = vmatpush.msrb.mxu0 %v1342_v37 }
 0x41e   :  { %1348 = vmatpush.msrb.mxu0 %v1341_v4 }
 0x420   :  { %1349 = vmatpush.msrb.mxu0 %v1340_v5 }
 0x422   :  { %1350 = vmatpush.msrb.mxu0 %v1339_v6 }
 0x424   :  { %1351 = vmatpush.msrb.mxu0 %v1338_v7 }
 0x426   :  { %1352 = vmatpush.msrb.mxu0 %v1337_v8 }
 0x428   :  { %1353 = vmatpush.msrb.mxu0 %v1336_v9 }
 0x42a   :  { %1354 = vmatpush.msrb.mxu0 %v1335_v10 }
 0x42c   :  { %1355 = vmatpush.msrb.mxu0 %v1334_v11 }
 0x42e   :  { %1356 = vmatpush.msrb.mxu0 %v1333_v12 }
 0x430   :  { %1357 = vmatpush.msrb.mxu0 %v1332_v14 }
 0x432   :  { %1358 = vmatpush.msrb.mxu0 %v1331_v15 }
 0x434   :  { %1359 = vmatpush.msrb.mxu0 %v1330_v16 }
 0x436   :  { %1360 = vmatpush.msrb.mxu0 %v1329_v17 }
 0x438   :  { %1361 = vmatpush.msrb.mxu0 %v1328_v18 }
 0x43a   :  { %1362 = vmatpush.msrb.mxu0 %v1327_v19 }
 0x497   :  { %v1128_v38 = vpop.f32.mrf.mxu0  ;;  %v1148_v41 = vpop.f32.mrf.mxu1 }
 0x498   :  { %v1191_v0 = vadd.f32 %v1128_v38, %v2942_v47  ;;  %v1192_v59 = vadd.f32 %v1148_v41, %v2943_v49 }
 0x49a   :  { %v1195_v56 = vmul.f32 0.5, %v1191_v0  ;;  %v1199_v63 = vmul.f32 0.5, %v1192_v59 }
 0x49c   :  { %1466 = vtanh.f32 %v1195_v56 }
 0x49d   :  { %1468 = vtanh.f32 %v1199_v63 }
 0x49e   :  { %v1168_v43 = vpop.f32.mrf.mxu2  ;;  %v1188_v36 = vpop.f32.mrf.mxu3 }
 0x49f   :  { %v1193_v42 = vadd.f32 %v1168_v43, %v2944_v35  ;;  %v1194_v62 = vadd.f32 %v1188_v36, %v2945_v48 }
 0x4a1   :  { %1470 = vtanh.f32 %v1193_v42  ;;  %v1204_v52 = vmul.f32 0.5, %v1194_v62  ;;  %v1405_v42 = vld [vmem:[%s2672_s5] ss:$0 sm:$0xff] }
 0x4a2   :  { %v1467_v46 = vpop.eup %1466 }
 0x4a3   :  { %v1469_v45 = vpop.eup %1468  ;;  %v1197_v58 = vmul.f32 0.5, %v1467_v46  ;;  %1472 = vtanh.f32 %v1204_v52 }
 0x4a4   :  { %v1201_v54 = vmul.f32 0.5, %v1469_v45 }
 0x4a5   :  { %v1198_v61 = vadd.f32 0.5, %v1197_v58 }
 0x4a6   :  { %v1202_v50 = vadd.f32 0.5, %v1201_v54 }
 0x4a7   :  { %v1471_v39 = vpop.eup %1470 }
 0x4a8   :  { %v1208_v44 = vmul.f32 %v1202_v50, %v1101_v60  ;;  %v1209_v55 = vmul.f32 %v1471_v39, %v1198_v61 }
 0x4a9   :  { %v1473_v26 = vpop.eup %1472 }
 0x4aa   :  { %v1210_v57 = vadd.f32 %v1209_v55, %v1208_v44  ;;  %v1206_v53 = vmul.f32 0.5, %v1473_v26 }
 0x4ac   :  { %1474 = vtanh.f32 %v1210_v57  ;;  %v1207_v1 = vadd.f32 0.5, %v1206_v53 }
 0x4b2   :  { %v1475_v2 = vpop.eup %1474 }
 0x4b3   :  { %v1212_v3 = vmul.f32 %v1475_v2, %v1207_v1 }
 0x4b5   :  { %1236 = vmatmul.f32.vlgmr.msra.gmra.mxu0 %v1212_v3  ;;  %1256 = vmatmul.f32.vlgmr.msra.gmra.mxu1 %v1212_v3 }
 0x4b6   :  { %1276 = vmatmul.f32.vlgmr.msra.gmra.mxu2 %v1212_v3  ;;  %1296 = vmatmul.f32.vlgmr.msra.gmra.mxu3 %v1212_v3 }
 0x532   :  { %v1237_v20 = vpop.f32.mrf.mxu0  ;;  %v1257_v21 = vpop.f32.mrf.mxu1 }
 0x533   :  { %v1300_v23 = vadd.f32 %v1237_v20, %v2946_v22  ;;  %v1301_v25 = vadd.f32 %v1257_v21, %v2947_v24 }
 0x535   :  { %v1304_v27 = vmul.f32 0.5, %v1300_v23  ;;  %v1308_v28 = vmul.f32 0.5, %v1301_v25 }
 0x537   :  { %1476 = vtanh.f32 %v1304_v27 }
 0x538   :  { %1478 = vtanh.f32 %v1308_v28 }
 0x539   :  { %v1277_v29 = vpop.f32.mrf.mxu2  ;;  %v1297_v30 = vpop.f32.mrf.mxu3 }
 0x53a   :  { %v1302_v32 = vadd.f32 %v1277_v29, %v2948_v31  ;;  %v1303_v60 = vadd.f32 %v1297_v30, %v2949_v13 }
 0x53c   :  { %1480 = vtanh.f32 %v1302_v32  ;;  %v1313_v33 = vmul.f32 0.5, %v1303_v60 }
 0x53d   :  { %v1477_v34 = vpop.eup %1476 }
 0x53e   :  { %v1479_v51 = vpop.eup %1478  ;;  %v1306_v40 = vmul.f32 0.5, %v1477_v34  ;;  %1482 = vtanh.f32 %v1313_v33 }
 0x53f   :  { %v1310_v37 = vmul.f32 0.5, %v1479_v51 }
 0x540   :  { %v1307_v38 = vadd.f32 0.5, %v1306_v40 }
 0x541   :  { %v1311_v41 = vadd.f32 0.5, %v1310_v37 }
 0x542   :  { %v1481_v47 = vpop.eup %1480 }
 0x543   :  { %v1317_v0 = vmul.f32 %v1311_v41, %v1210_v57  ;;  %v1318_v49 = vmul.f32 %v1481_v47, %v1307_v38 }
 0x544   :  { %v1483_v59 = vpop.eup %1482 }
 0x545   :  { %v1319_v56 = vadd.f32 %v1318_v49, %v1317_v0  ;;  %v1315_v63 = vmul.f32 0.5, %v1483_v59 }
 0x547   :  { %1484 = vtanh.f32 %v1319_v56  ;;  %v1316_v43 = vadd.f32 0.5, %v1315_v63 }
 0x54d   :  { %v1485_v36 = vpop.eup %1484 }
 0x54e   :  { %v1321_v35 = vmul.f32 %v1485_v36, %v1316_v43 }
 0x550   :  { %1363 = vmatmul.f32.vlgmr.msrb.gmra.mxu0 %v1321_v35 }
 0x5cd   :  { %v1364_v48 = vpop.f32.mrf.mxu0 }
 0x5ce   :  { %v1365_v62 = vadd.f32 %v1405_v42, %v1364_v48 }
 0x5d0   :  { %1367 = vst [vmem:[#allocation14] sm:$0xff] %v1365_v62 }
 0x5d1   :  { %1378 = dma.vmem_to_hbm [thread:$0]  %s1374_s24, 128, %s1376_s27, [#allocation7]  }
 0x5d2   :  { %1700 = dma.done.wait [#allocation7], 128  }
 0x5d3   :  { %1701 = vsyncadd [#allocation7], 4294967168 }
 0x5d4   :  { %1383 = vsyncpa [#allocation6], 1 }
 0x5d5   :  { %1384 = vsyncpa [#allocation9], 1 }
 0x5d6   :  { %1385 = vsyncpa [#allocation12], 1 }
 0x5d7   :  { %1386 = vsyncpa [#allocation7], 1 }

</bundles_post_ra>
